<compile_context>
chip_gen: v7x
topology: tpu7x:2x2x1
jax: 0.10.0
libtpu: 0.0.40
codegen_flags: <defaults>
</compile_context>

<pallas_src>
import jax
import jax.numpy as jnp
from jax import lax
from jax.experimental import pallas as pl
from jax.experimental.pallas import tpu as pltpu

EPS = 1e-5      # PyTorch BatchNorm2d default eps
LANE = 128      # pad all channel dims to a multiple of the 128-lane vreg width
GUARD = 16      # zero guard rows at both ends of the padded-y1 scratch buffers


def _round_up(v, m):
    return ((v + m - 1) // m) * m


def _choose_row_tile(H, W, target_rows=1024):
    """Largest divisor of H whose flattened tile (rows * W) stays near `target_rows`
    (big tiles -> HBM-roofline friendly on v6e), preferring >=2 row tiles so grid
    steps pipeline / shard across TensorCores (v7x)."""
    divisors = [d for d in range(1, H + 1) if H % d == 0]
    fitting = [d for d in divisors if d * W <= target_rows]
    th = fitting[-1] if fitting else 1
    if th == H and H > 1:
        th = divisors[-2]          # force at least two row tiles when possible
    return th
    # TODO(synk): support ragged H % TH != 0 tiles (masked last tile).


# ---------------------------------------------------------------------------
# Fused Pallas kernel
# ---------------------------------------------------------------------------
def _make_bottleneck_kernel(H, W, TH, Cin_p, P_p, Cout_p):
    R = TH * W               # output pixels (flattened rows) per grid step
    ROWS = R + 2 * W         # plus one halo image-row above and below
    G = GUARD

    def kernel(x_ref, xt_ref, xb_ref, w1_ref, b1_ref, w2_ref, b2_ref,
               w3_ref, b3_ref, o_ref, padc_ref, padl_ref, padr_ref, col_ref):
        t = pl.program_id(1)
        nt = pl.num_programs(1)

        # ---- conv1 (1x1) + bn1 + relu over halo+main rows: one MXU dot -----
        xm = x_ref[...].reshape(R, Cin_p)                               # (R, Cin) bf16
        xin = jnp.concatenate([xt_ref[0], xm, xb_ref[0]], axis=0)       # (ROWS, Cin)
        y1 = jnp.dot(xin, w1_ref[...], preferred_element_type=jnp.float32)
        y1 = jnp.maximum(y1 + b1_ref[...], 0.0)                         # (ROWS, P) f32

        # ---- boundary masks -------------------------------------------------
        # rows: the halo image-row lies outside the picture on the first/last tile
        # cols: build left-/right-column-zeroed copies of y1 once, so the 3x3 taps
        #       below need no per-tap select (2 big selects instead of 6)
        rid = lax.broadcasted_iota(jnp.int32, (ROWS, 1), 0)
        cid = rid % W
        drop = jnp.logical_or(jnp.logical_and(t == 0, rid < W),
                              jnp.logical_and(t == nt - 1, rid >= W + R))
        y1 = jnp.where(drop, 0.0, y1)
        y1c = y1.astype(jnp.bfloat16)
        y1l = jnp.where(cid == 0, 0.0, y1).astype(jnp.bfloat16)         # col 0 zeroed
        y1r = jnp.where(cid == W - 1, 0.0, y1).astype(jnp.bfloat16)     # col W-1 zeroed

        zero_g = jnp.zeros((G, P_p), jnp.bfloat16)
        for buf, val in ((padc_ref, y1c), (padl_ref, y1l), (padr_ref, y1r)):
            buf[0:G, :] = zero_g                       # guards are tiny; rewriting them
            buf[G + ROWS:G + ROWS + G, :] = zero_g     # every step stays megacore-safe
            buf[G:G + ROWS, :] = val

        # ---- conv2 (3x3, pad=1): im2col in VMEM -> single K = 9*P MXU dot ---
        for k in range(9):
            dy, dx = k // 3 - 1, k % 3 - 1
            src = padr_ref if dx < 0 else (padc_ref if dx == 0 else padl_ref)
            start = G + (dy + 1) * W + dx
            col_ref[:, k * P_p:(k + 1) * P_p] = src[start:start + R, :]
        y2 = jnp.dot(col_ref[...], w2_ref[...], preferred_element_type=jnp.float32)
        y2 = jnp.maximum(y2 + b2_ref[...], 0.0).astype(jnp.bfloat16)    # (R, P)

        # ---- conv3 (1x1) + bn3 + identity residual + relu -------------------
        y3 = jnp.dot(y2, w3_ref[...], preferred_element_type=jnp.float32) + b3_ref[...]
        out = jnp.maximum(y3 + xm.astype(jnp.float32), 0.0)
        o_ref[...] = out.astype(o_ref.dtype).reshape(TH, W, Cout_p)

    return kernel


# ---------------------------------------------------------------------------
# Forward wrapper (stride=1, dilation=1, downsample=None => inplanes == 4*planes)
# ---------------------------------------------------------------------------
def bottleneck_forward(x_nchw, params):
    B, Cin, H, W = x_nchw.shape
    Cin_p, P_p = params["w1"].shape
    Cout_p = params["w3"].shape[1]
    assert Cin_p == Cout_p, "identity residual requires inplanes == 4*planes"
    Cout = Cin                                      # identity residual path
    TH = _choose_row_tile(H, W)
    assert H % TH == 0
    R = TH * W
    ROWS = R + 2 * W
    NBUF = ROWS + 2 * GUARD

    # NCHW -> NHWC, bf16, channels zero-padded to a lane-dense multiple of 128.
    # TODO(synk): in a full network keep activations NHWC/bf16 end-to-end across
    # blocks so this transpose/pad is done once, not per block.
    x = jnp.transpose(x_nchw, (0, 2, 3, 1)).astype(jnp.bfloat16)
    if Cin_p != Cin:
        x = jnp.pad(x, ((0, 0), (0, 0), (0, 0), (0, Cin_p - Cin)))

    kernel = _make_bottleneck_kernel(H, W, TH, Cin_p, P_p, Cout_p)

    # ---- cost / VMEM bookkeeping -------------------------------------------
    wbytes = (Cin_p * P_p + 9 * P_p * P_p + P_p * Cout_p) * 2 + (2 * P_p + Cout_p) * 4
    flops = 2 * B * H * W * (Cin_p * P_p + 9 * P_p * P_p + P_p * Cout_p)
    bytes_accessed = B * H * W * (Cin_p + Cout_p) * 2 + wbytes
    cost = pl.CostEstimate(flops=flops, transcendentals=0, bytes_accessed=bytes_accessed)

    tile_bytes = (ROWS * Cin_p + R * Cout_p) * 2            # in + out tiles (bf16)
    scratch_bytes = (3 * NBUF * P_p + R * 9 * P_p) * 2      # padded-y1 x3 + im2col
    live_bytes = 12 * ROWS * max(P_p, Cout_p) * 4           # f32 intermediates headroom
    vmem_need = 2 * (tile_bytes + wbytes) + scratch_bytes + live_bytes
    try:                                                     # generation-aware cap
        vmem_cap = pltpu.get_tpu_info().vmem_capacity_bytes
    except Exception:
        vmem_cap = 64 * 1024 * 1024                          # conservative (v7x)
    vmem_limit = max(16 * 1024 * 1024, min(int(0.55 * vmem_cap), 2 * vmem_need))
    vmem_limit = int(min(max(vmem_limit, vmem_need + (4 << 20)), int(0.9 * vmem_cap)))

    grid = (B, H // TH)
    # TODO(synk): pipeline_mode=pl.Buffered(1) on the (grid-invariant) weight specs
    # would drop their second VMEM buffer on v7x; left at the default for safety.
    out = pl.pallas_call(
        kernel,
        out_shape=jax.ShapeDtypeStruct((B, H, W, Cout_p), jnp.bfloat16),
        grid=grid,
        in_specs=[
            pl.BlockSpec((None, TH, W, Cin_p), lambda b, t: (b, t, 0, 0)),           # main rows
            pl.BlockSpec((None, 1, W, Cin_p),
                         lambda b, t: (b, jnp.maximum(t * TH - 1, 0), 0, 0)),         # top halo row
            pl.BlockSpec((None, 1, W, Cin_p),
                         lambda b, t: (b, jnp.minimum((t + 1) * TH, H - 1), 0, 0)),   # bottom halo row
            pl.BlockSpec((Cin_p, P_p), lambda b, t: (0, 0)),                          # w1 (bn1 folded)
            pl.BlockSpec((1, P_p), lambda b, t: (0, 0)),                              # bn1 shift
            pl.BlockSpec((9 * P_p, P_p), lambda b, t: (0, 0)),                        # w2 taps (bn2 folded)
            pl.BlockSpec((1, P_p), lambda b, t: (0, 0)),                              # bn2 shift
            pl.BlockSpec((P_p, Cout_p), lambda b, t: (0, 0)),                         # w3 (bn3 folded)
            pl.BlockSpec((1, Cout_p), lambda b, t: (0, 0)),                           # bn3 shift
        ],
        out_specs=pl.BlockSpec((None, TH, W, Cout_p), lambda b, t: (b, t, 0, 0)),
        scratch_shapes=[pltpu.VMEM((NBUF, P_p), jnp.bfloat16),     # padded y1 (center)
                        pltpu.VMEM((NBUF, P_p), jnp.bfloat16),     # padded y1, col 0 zeroed
                        pltpu.VMEM((NBUF, P_p), jnp.bfloat16),     # padded y1, col W-1 zeroed
                        pltpu.VMEM((R, 9 * P_p), jnp.bfloat16)],   # im2col tile
        compiler_params=pltpu.CompilerParams(
            dimension_semantics=("parallel", "parallel"),
            vmem_limit_bytes=vmem_limit),
        cost_estimate=cost,
    )(x, x, x, params["w1"], params["b1"], params["w2"], params["b2"],
      params["w3"], params["b3"])

    # drop channel padding and return to NCHW while still bf16, then cast once
    out = jnp.transpose(out[..., :Cout], (0, 3, 1, 2)).astype(jnp.float32)
    return out
    # TODO(synk): downsample branch / stride>1 / dilation>1 variants of the module
    # are not implemented (defaults only: stride=1, dilation=1, downsample=None).


# ---------------------------------------------------------------------------
# Parameter construction (matching nn.Module shapes; BN scale folded into W,
# everything padded to lane-dense shapes and cast to bf16)
# ---------------------------------------------------------------------------
def make_params(key, inplanes, planes):
    ks = jax.random.split(key, 15)
    Cin, P, Cout = inplanes, planes, planes * 4
    Cin_p, P_p, Cout_p = (_round_up(c, LANE) for c in (Cin, P, Cout))

    w1_oihw = 0.1 * jax.random.normal(ks[0], (P, Cin, 1, 1), jnp.float32)
    w2_oihw = 0.1 * jax.random.normal(ks[1], (P, P, 3, 3), jnp.float32)
    w3_oihw = 0.1 * jax.random.normal(ks[2], (Cout, P, 1, 1), jnp.float32)

    def bn(kg, kb, km, kv, c):
        gamma = 0.5 + jax.random.uniform(kg, (c,), jnp.float32)
        beta = 0.1 * jax.random.normal(kb, (c,), jnp.float32)
        mean = 0.1 * jax.random.normal(km, (c,), jnp.float32)
        var = 0.5 + jax.random.uniform(kv, (c,), jnp.float32)
        scale = gamma / jnp.sqrt(var + EPS)
        shift = beta - mean * scale
        return (gamma, beta, mean, var), scale, shift

    bn1, s1, b1 = bn(ks[3], ks[4], ks[5], ks[6], P)
    bn2, s2, b2 = bn(ks[7], ks[8], ks[9], ks[10], P)
    bn3, s3, b3 = bn(ks[11], ks[12], ks[13], ks[14], Cout)

    # fold BN scale into the conv weight output columns
    w1 = jnp.transpose(w1_oihw[:, :, 0, 0]) * s1[None, :]                       # (Cin, P)
    w2 = jnp.transpose(w2_oihw, (2, 3, 1, 0)).reshape(9, P, P) * s2[None, None, :]
    w3 = jnp.transpose(w3_oihw[:, :, 0, 0]) * s3[None, :]                       # (P, Cout)

    # zero-pad to lane-dense shapes (padded channels stay exactly zero end-to-end)
    w1p = jnp.zeros((Cin_p, P_p), jnp.float32).at[:Cin, :P].set(w1)
    w2p = jnp.zeros((9, P_p, P_p), jnp.float32).at[:, :P, :P].set(w2).reshape(9 * P_p, P_p)
    w3p = jnp.zeros((P_p, Cout_p), jnp.float32).at[:P, :Cout].set(w3)
    b1p = jnp.zeros((1, P_p), jnp.float32).at[0, :P].set(b1)
    b2p = jnp.zeros((1, P_p), jnp.float32).at[0, :P].set(b2)
    b3p = jnp.zeros((1, Cout_p), jnp.float32).at[0, :Cout].set(b3)

    params = {"w1": w1p.astype(jnp.bfloat16), "b1": b1p,
              "w2": w2p.astype(jnp.bfloat16), "b2": b2p,
              "w3": w3p.astype(jnp.bfloat16), "b3": b3p}
    raw = {"w1_oihw": w1_oihw, "w2_oihw": w2_oihw, "w3_oihw": w3_oihw,
           "bn1": bn1, "bn2": bn2, "bn3": bn3}
    return params, raw


# ---------------------------------------------------------------------------
# References for correctness
# ---------------------------------------------------------------------------
def reference_forward(x_nchw, raw):
    """Pure-f32 lax-conv reference of the PyTorch module (loose check)."""
    dn = ("NHWC", "HWIO", "NHWC")
    x = jnp.transpose(x_nchw, (0, 2, 3, 1)).astype(jnp.float32)

    def bn(y, p):
        g, b, m, v = p
        return (y - m) / jnp.sqrt(v + EPS) * g + b

    def hwio(w):
        return jnp.transpose(w, (2, 3, 1, 0))

    y = lax.conv_general_dilated(x, hwio(raw["w1_oihw"]), (1, 1), "VALID",
                                 dimension_numbers=dn)
    y = jax.nn.relu(bn(y, raw["bn1"]))
    y = lax.conv_general_dilated(y, hwio(raw["w2_oihw"]), (1, 1),
                                 ((1, 1), (1, 1)), dimension_numbers=dn)
    y = jax.nn.relu(bn(y, raw["bn2"]))
    y = lax.conv_general_dilated(y, hwio(raw["w3_oihw"]), (1, 1), "VALID",
                                 dimension_numbers=dn)
    y = bn(y, raw["bn3"])
    out = jax.nn.relu(y + x)
    return jnp.transpose(out, (0, 3, 1, 2))


def matched_reference(x_nchw, params):
    """Plain-JAX mirror of the kernel's padded bf16/f32 math (tight check)."""
    B, Cin, H, W = x_nchw.shape
    Cin_p, P_p = params["w1"].shape
    x = jnp.transpose(x_nchw, (0, 2, 3, 1)).astype(jnp.bfloat16).astype(jnp.float32)
    x = jnp.pad(x, ((0, 0), (0, 0), (0, 0), (0, Cin_p - Cin)))
    w1 = params["w1"].astype(jnp.float32)
    w2 = params["w2"].astype(jnp.float32).reshape(3, 3, P_p, P_p)
    w3 = params["w3"].astype(jnp.float32)

    y1 = jnp.maximum(jnp.einsum("bhwc,cp->bhwp", x, w1) + params["b1"][0], 0.0)
    y1 = y1.astype(jnp.bfloat16).astype(jnp.float32)
    y1p = jnp.pad(y1, ((0, 0), (1, 1), (1, 1), (0, 0)))
    acc = jnp.zeros((B, H, W, P_p), jnp.float32)
    for ky in range(3):
        for kx in range(3):
            acc = acc + jnp.einsum("bhwc,cp->bhwp",
                                   y1p[:, ky:ky + H, kx:kx + W, :], w2[ky, kx])
    y2 = jnp.maximum(acc + params["b2"][0], 0.0).astype(jnp.bfloat16).astype(jnp.float32)
    y3 = jnp.einsum("bhwc,cp->bhwp", y2, w3) + params["b3"][0]
    out = jnp.maximum(y3 + x, 0.0).astype(jnp.bfloat16).astype(jnp.float32)
    return jnp.transpose(out[..., :Cin], (0, 3, 1, 2))


if __name__ == "__main__":
    # downsample is None in the module default, so the residual add requires
    # inplanes == planes * expansion  ->  inplanes=16, planes=4
    B, inplanes, planes, H, W = 2, 16, 4, 16, 16

    key = jax.random.PRNGKey(0)
    kx, kp = jax.random.split(key)
    x = jax.random.normal(kx, (B, inplanes, H, W), jnp.float32)   # NCHW like PyTorch
    params, raw = make_params(kp, inplanes, planes)

    fwd = jax.jit(bottleneck_forward)
    out = jax.block_until_ready(fwd(x, params))
    assert out.shape == (B, inplanes, H, W)
    assert bool(jnp.all(jnp.isfinite(out)))

    # Tight check against an exact emulation of the kernel's bf16/f32 math
    # (tolerance sized for the bf16 output quantization, ~1 ulp at |v|<=4).
    ref_b = jax.block_until_ready(matched_reference(x, params))
    err_b = float(jnp.max(jnp.abs(out - ref_b)))
    assert jnp.allclose(out, ref_b, atol=7.5e-2, rtol=3e-2), f"bf16-matched err {err_b}"

    # Loose check against the full-f32 lax-conv reference (bf16 quantization noise).
    ref_f = jax.block_until_ready(reference_forward(x, raw))
    err_f = float(jnp.max(jnp.abs(out - ref_f)))
    assert jnp.allclose(out, ref_f, atol=2e-1, rtol=2e-1), f"f32-ref err {err_f}"

    print("KERNEL_OK")
</pallas_src>

<mosaic_0001>
module attributes {stable_mosaic.version = 11 : i64} {
  func.func @kernel(%arg0: i32, %arg1: i32, %arg2: memref<1x8x16x128xbf16, #tpu.memory_space<vmem>>, %arg3: memref<1x1x16x128xbf16, #tpu.memory_space<vmem>>, %arg4: memref<1x1x16x128xbf16, #tpu.memory_space<vmem>>, %arg5: memref<128x128xbf16, #tpu.memory_space<vmem>>, %arg6: memref<1x128xf32, #tpu.memory_space<vmem>>, %arg7: memref<1152x128xbf16, #tpu.memory_space<vmem>>, %arg8: memref<1x128xf32, #tpu.memory_space<vmem>>, %arg9: memref<128x128xbf16, #tpu.memory_space<vmem>>, %arg10: memref<1x128xf32, #tpu.memory_space<vmem>>, %arg11: memref<1x8x16x128xbf16, #tpu.memory_space<vmem>>, %arg12: memref<192x128xbf16, #tpu.memory_space<vmem>>, %arg13: memref<192x128xbf16, #tpu.memory_space<vmem>>, %arg14: memref<192x128xbf16, #tpu.memory_space<vmem>>, %arg15: memref<128x1152xbf16, #tpu.memory_space<vmem>>) attributes {dimension_semantics = [#tpu.dimension_semantics<parallel>, #tpu.dimension_semantics<parallel>], iteration_bounds = array<i64: 2, 2>, scalar_prefetch = 0 : i64, scratch_operands = 4 : i64, tpu.core_type = #tpu.core_type<tc>, window_params = [{transform_indices = @transform_0, window_bounds = array<i64: 1, 8, 16, 128>}, {transform_indices = @transform_1, window_bounds = array<i64: 1, 1, 16, 128>}, {transform_indices = @transform_2, window_bounds = array<i64: 1, 1, 16, 128>}, {pipeline_mode = #tpu.pipeline_mode<synchronous>, transform_indices = @transform_3, window_bounds = array<i64: 128, 128>}, {pipeline_mode = #tpu.pipeline_mode<synchronous>, transform_indices = @transform_4, window_bounds = array<i64: 1, 128>}, {pipeline_mode = #tpu.pipeline_mode<synchronous>, transform_indices = @transform_5, window_bounds = array<i64: 1152, 128>}, {pipeline_mode = #tpu.pipeline_mode<synchronous>, transform_indices = @transform_6, window_bounds = array<i64: 1, 128>}, {pipeline_mode = #tpu.pipeline_mode<synchronous>, transform_indices = @transform_7, window_bounds = array<i64: 128, 128>}, {pipeline_mode = #tpu.pipeline_mode<synchronous>, transform_indices = @transform_8, window_bounds = array<i64: 1, 128>}, {transform_indices = @transform_9, window_bounds = array<i64: 1, 8, 16, 128>}]} {
    %c0 = arith.constant 0 : index
    %c0_0 = arith.constant 0 : index
    %c0_1 = arith.constant 0 : index
    %c0_2 = arith.constant 0 : index
    %0 = vector.load %arg2[%c0, %c0_0, %c0_1, %c0_2] : memref<1x8x16x128xbf16, #tpu.memory_space<vmem>>, vector<1x8x16x128xbf16>
    %1 = vector.shape_cast %0 : vector<1x8x16x128xbf16> to vector<8x16x128xbf16>
    %2 = vector.shape_cast %1 : vector<8x16x128xbf16> to vector<128x128xbf16>
    %c0_3 = arith.constant 0 : index
    %c0_4 = arith.constant 0 : index
    %c0_5 = arith.constant 0 : index
    %c0_6 = arith.constant 0 : index
    %3 = vector.load %arg3[%c0_3, %c0_4, %c0_5, %c0_6] : memref<1x1x16x128xbf16, #tpu.memory_space<vmem>>, vector<1x1x16x128xbf16>
    %4 = vector.shape_cast %3 : vector<1x1x16x128xbf16> to vector<16x128xbf16>
    %c0_7 = arith.constant 0 : index
    %c0_8 = arith.constant 0 : index
    %c0_9 = arith.constant 0 : index
    %c0_10 = arith.constant 0 : index
    %5 = vector.load %arg4[%c0_7, %c0_8, %c0_9, %c0_10] : memref<1x1x16x128xbf16, #tpu.memory_space<vmem>>, vector<1x1x16x128xbf16>
    %6 = vector.shape_cast %5 : vector<1x1x16x128xbf16> to vector<16x128xbf16>
    %7 = tpu.concatenate %4, %2, %6 in 0 : vector<16x128xbf16>, vector<128x128xbf16>, vector<16x128xbf16> -> vector<160x128xbf16>
    %c0_11 = arith.constant 0 : index
    %c0_12 = arith.constant 0 : index
    %8 = vector.load %arg5[%c0_11, %c0_12] : memref<128x128xbf16, #tpu.memory_space<vmem>>, vector<128x128xbf16>
    %cst = arith.constant dense<0.000000e+00> : vector<160x128xf32>
    %9 = tpu.matmul %7, %8, %cst {dimension_numbers = #tpu.dot_dimension_numbers<[1], [0], [0], [1], [0, 0, 1, 1], [], []>} : vector<160x128xbf16>, vector<128x128xbf16>, vector<160x128xf32> -> vector<160x128xf32>
    %c0_13 = arith.constant 0 : index
    %c0_14 = arith.constant 0 : index
    %10 = vector.load %arg6[%c0_13, %c0_14] : memref<1x128xf32, #tpu.memory_space<vmem>>, vector<1x128xf32>
    %11 = vector.broadcast %10 : vector<1x128xf32> to vector<160x128xf32>
    %12 = arith.addf %9, %11 : vector<160x128xf32>
    %cst_15 = arith.constant 0.000000e+00 : f32
    %13 = vector.broadcast %cst_15 : f32 to vector<160x128xf32>
    %14 = arith.maximumf %12, %13 : vector<160x128xf32>
    %15 = tpu.iota {dimensions = array<i32: 0>} : vector<160x1xi32>
    %c16_i32 = arith.constant 16 : i32
    %c0_i32 = arith.constant 0 : i32
    %16 = arith.cmpi eq, %c16_i32, %c0_i32 : i32
    %c1_i32 = arith.constant 1 : i32
    %17 = arith.select %16, %c1_i32, %c16_i32 : i32
    %18 = vector.broadcast %17 : i32 to vector<160x1xi32>
    %19 = arith.remsi %15, %18 : vector<160x1xi32>
    %c0_i32_16 = arith.constant 0 : i32
    %20 = vector.broadcast %c0_i32_16 : i32 to vector<160x1xi32>
    %21 = arith.cmpi ne, %19, %20 : vector<160x1xi32>
    %c0_i32_17 = arith.constant 0 : i32
    %22 = vector.broadcast %c0_i32_17 : i32 to vector<160x1xi32>
    %23 = arith.cmpi slt, %19, %22 : vector<160x1xi32>
    %c0_i32_18 = arith.constant 0 : i32
    %24 = arith.cmpi slt, %17, %c0_i32_18 : i32
    %25 = vector.broadcast %24 : i1 to vector<160x1xi1>
    %26 = vector.broadcast %25 : vector<160x1xi1> to vector<160x1xi1>
    %27 = arith.xori %23, %26 : vector<160x1xi1>
    %28 = arith.andi %27, %21 : vector<160x1xi1>
    %29 = vector.broadcast %17 : i32 to vector<160x1xi32>
    %30 = arith.addi %19, %29 : vector<160x1xi32>
    %31 = arith.select %28, %30, %19 : vector<160x1xi1>, vector<160x1xi32>
    %c0_i32_19 = arith.constant 0 : i32
    %32 = arith.cmpi eq, %arg1, %c0_i32_19 : i32
    %c16_i32_20 = arith.constant 16 : i32
    %33 = vector.broadcast %c16_i32_20 : i32 to vector<160x1xi32>
    %34 = arith.cmpi slt, %15, %33 : vector<160x1xi32>
    %35 = vector.broadcast %32 : i1 to vector<160x1xi1>
    %36 = arith.andi %35, %34 : vector<160x1xi1>
    %c1_i32_21 = arith.constant 1 : i32
    %37 = arith.cmpi eq, %arg1, %c1_i32_21 : i32
    %c144_i32 = arith.constant 144 : i32
    %38 = vector.broadcast %c144_i32 : i32 to vector<160x1xi32>
    %39 = arith.cmpi sge, %15, %38 : vector<160x1xi32>
    %40 = vector.broadcast %37 : i1 to vector<160x1xi1>
    %41 = arith.andi %40, %39 : vector<160x1xi1>
    %42 = arith.ori %36, %41 : vector<160x1xi1>
    %cst_22 = arith.constant 0.000000e+00 : f32
    %43 = vector.shape_cast %42 : vector<160x1xi1> to vector<160x1xi1>
    %44 = vector.broadcast %43 : vector<160x1xi1> to vector<160x128xi1>
    %45 = vector.broadcast %cst_22 : f32 to vector<160x128xf32>
    %46 = arith.select %44, %45, %14 : vector<160x128xi1>, vector<160x128xf32>
    %47 = arith.truncf %46 : vector<160x128xf32> to vector<160x128xbf16>
    %c0_i32_23 = arith.constant 0 : i32
    %48 = vector.broadcast %c0_i32_23 : i32 to vector<160x1xi32>
    %49 = arith.cmpi eq, %31, %48 : vector<160x1xi32>
    %cst_24 = arith.constant 0.000000e+00 : f32
    %50 = vector.shape_cast %49 : vector<160x1xi1> to vector<160x1xi1>
    %51 = vector.broadcast %50 : vector<160x1xi1> to vector<160x128xi1>
    %52 = vector.broadcast %cst_24 : f32 to vector<160x128xf32>
    %53 = arith.select %51, %52, %46 : vector<160x128xi1>, vector<160x128xf32>
    %54 = arith.truncf %53 : vector<160x128xf32> to vector<160x128xbf16>
    %c15_i32 = arith.constant 15 : i32
    %55 = vector.broadcast %c15_i32 : i32 to vector<160x1xi32>
    %56 = arith.cmpi eq, %31, %55 : vector<160x1xi32>
    %cst_25 = arith.constant 0.000000e+00 : f32
    %57 = vector.shape_cast %56 : vector<160x1xi1> to vector<160x1xi1>
    %58 = vector.broadcast %57 : vector<160x1xi1> to vector<160x128xi1>
    %59 = vector.broadcast %cst_25 : f32 to vector<160x128xf32>
    %60 = arith.select %58, %59, %46 : vector<160x128xi1>, vector<160x128xf32>
    %61 = arith.truncf %60 : vector<160x128xf32> to vector<160x128xbf16>
    %cst_26 = arith.constant 0.000000e+00 : bf16
    %62 = vector.broadcast %cst_26 : bf16 to vector<16x128xbf16>
    %c0_27 = arith.constant 0 : index
    %c0_28 = arith.constant 0 : index
    %63 = vector.load %arg12[%c0_27, %c0_28] : memref<192x128xbf16, #tpu.memory_space<vmem>>, vector<16x128xbf16>
    tpu.vector_store %arg12[%c0_27, %c0_28], %62 {strides = array<i32>} : memref<192x128xbf16, #tpu.memory_space<vmem>>, vector<16x128xbf16>,
    %c176 = arith.constant 176 : index
    %c0_29 = arith.constant 0 : index
    %64 = vector.load %arg12[%c176, %c0_29] : memref<192x128xbf16, #tpu.memory_space<vmem>>, vector<16x128xbf16>
    tpu.vector_store %arg12[%c176, %c0_29], %62 {strides = array<i32>} : memref<192x128xbf16, #tpu.memory_space<vmem>>, vector<16x128xbf16>,
    %c16 = arith.constant 16 : index
    %c0_30 = arith.constant 0 : index
    %65 = vector.load %arg12[%c16, %c0_30] : memref<192x128xbf16, #tpu.memory_space<vmem>>, vector<160x128xbf16>
    tpu.vector_store %arg12[%c16, %c0_30], %47 {strides = array<i32>} : memref<192x128xbf16, #tpu.memory_space<vmem>>, vector<160x128xbf16>,
    %c0_31 = arith.constant 0 : index
    %c0_32 = arith.constant 0 : index
    %66 = vector.load %arg13[%c0_31, %c0_32] : memref<192x128xbf16, #tpu.memory_space<vmem>>, vector<16x128xbf16>
    tpu.vector_store %arg13[%c0_31, %c0_32], %62 {strides = array<i32>} : memref<192x128xbf16, #tpu.memory_space<vmem>>, vector<16x128xbf16>,
    %c176_33 = arith.constant 176 : index
    %c0_34 = arith.constant 0 : index
    %67 = vector.load %arg13[%c176_33, %c0_34] : memref<192x128xbf16, #tpu.memory_space<vmem>>, vector<16x128xbf16>
    tpu.vector_store %arg13[%c176_33, %c0_34], %62 {strides = array<i32>} : memref<192x128xbf16, #tpu.memory_space<vmem>>, vector<16x128xbf16>,
    %c16_35 = arith.constant 16 : index
    %c0_36 = arith.constant 0 : index
    %68 = vector.load %arg13[%c16_35, %c0_36] : memref<192x128xbf16, #tpu.memory_space<vmem>>, vector<160x128xbf16>
    tpu.vector_store %arg13[%c16_35, %c0_36], %54 {strides = array<i32>} : memref<192x128xbf16, #tpu.memory_space<vmem>>, vector<160x128xbf16>,
    %c0_37 = arith.constant 0 : index
    %c0_38 = arith.constant 0 : index
    %69 = vector.load %arg14[%c0_37, %c0_38] : memref<192x128xbf16, #tpu.memory_space<vmem>>, vector<16x128xbf16>
    tpu.vector_store %arg14[%c0_37, %c0_38], %62 {strides = array<i32>} : memref<192x128xbf16, #tpu.memory_space<vmem>>, vector<16x128xbf16>,
    %c176_39 = arith.constant 176 : index
    %c0_40 = arith.constant 0 : index
    %70 = vector.load %arg14[%c176_39, %c0_40] : memref<192x128xbf16, #tpu.memory_space<vmem>>, vector<16x128xbf16>
    tpu.vector_store %arg14[%c176_39, %c0_40], %62 {strides = array<i32>} : memref<192x128xbf16, #tpu.memory_space<vmem>>, vector<16x128xbf16>,
    %c16_41 = arith.constant 16 : index
    %c0_42 = arith.constant 0 : index
    %71 = vector.load %arg14[%c16_41, %c0_42] : memref<192x128xbf16, #tpu.memory_space<vmem>>, vector<160x128xbf16>
    tpu.vector_store %arg14[%c16_41, %c0_42], %61 {strides = array<i32>} : memref<192x128xbf16, #tpu.memory_space<vmem>>, vector<160x128xbf16>,
    %c15 = arith.constant 15 : index
    %c0_43 = arith.constant 0 : index
    %72 = vector.load %arg14[%c15, %c0_43] : memref<192x128xbf16, #tpu.memory_space<vmem>>, vector<128x128xbf16>
    %c0_44 = arith.constant 0 : index
    %c0_45 = arith.constant 0 : index
    %73 = vector.load %arg15[%c0_44, %c0_45] : memref<128x1152xbf16, #tpu.memory_space<vmem>>, vector<128x128xbf16>
    tpu.vector_store %arg15[%c0_44, %c0_45], %72 {strides = array<i32>} : memref<128x1152xbf16, #tpu.memory_space<vmem>>, vector<128x128xbf16>,
    %c16_46 = arith.constant 16 : index
    %c0_47 = arith.constant 0 : index
    %74 = vector.load %arg12[%c16_46, %c0_47] : memref<192x128xbf16, #tpu.memory_space<vmem>>, vector<128x128xbf16>
    %c0_48 = arith.constant 0 : index
    %c128 = arith.constant 128 : index
    %75 = vector.load %arg15[%c0_48, %c128] : memref<128x1152xbf16, #tpu.memory_space<vmem>>, vector<128x128xbf16>
    tpu.vector_store %arg15[%c0_48, %c128], %74 {strides = array<i32>} : memref<128x1152xbf16, #tpu.memory_space<vmem>>, vector<128x128xbf16>,
    %c17 = arith.constant 17 : index
    %c0_49 = arith.constant 0 : index
    %76 = vector.load %arg13[%c17, %c0_49] : memref<192x128xbf16, #tpu.memory_space<vmem>>, vector<128x128xbf16>
    %c0_50 = arith.constant 0 : index
    %c256 = arith.constant 256 : index
    %77 = vector.load %arg15[%c0_50, %c256] : memref<128x1152xbf16, #tpu.memory_space<vmem>>, vector<128x128xbf16>
    tpu.vector_store %arg15[%c0_50, %c256], %76 {strides = array<i32>} : memref<128x1152xbf16, #tpu.memory_space<vmem>>, vector<128x128xbf16>,
    %c31 = arith.constant 31 : index
    %c0_51 = arith.constant 0 : index
    %78 = vector.load %arg14[%c31, %c0_51] : memref<192x128xbf16, #tpu.memory_space<vmem>>, vector<128x128xbf16>
    %c0_52 = arith.constant 0 : index
    %c384 = arith.constant 384 : index
    %79 = vector.load %arg15[%c0_52, %c384] : memref<128x1152xbf16, #tpu.memory_space<vmem>>, vector<128x128xbf16>
    tpu.vector_store %arg15[%c0_52, %c384], %78 {strides = array<i32>} : memref<128x1152xbf16, #tpu.memory_space<vmem>>, vector<128x128xbf16>,
    %c32 = arith.constant 32 : index
    %c0_53 = arith.constant 0 : index
    %80 = vector.load %arg12[%c32, %c0_53] : memref<192x128xbf16, #tpu.memory_space<vmem>>, vector<128x128xbf16>
    %c0_54 = arith.constant 0 : index
    %c512 = arith.constant 512 : index
    %81 = vector.load %arg15[%c0_54, %c512] : memref<128x1152xbf16, #tpu.memory_space<vmem>>, vector<128x128xbf16>
    tpu.vector_store %arg15[%c0_54, %c512], %80 {strides = array<i32>} : memref<128x1152xbf16, #tpu.memory_space<vmem>>, vector<128x128xbf16>,
    %c33 = arith.constant 33 : index
    %c0_55 = arith.constant 0 : index
    %82 = vector.load %arg13[%c33, %c0_55] : memref<192x128xbf16, #tpu.memory_space<vmem>>, vector<128x128xbf16>
    %c0_56 = arith.constant 0 : index
    %c640 = arith.constant 640 : index
    %83 = vector.load %arg15[%c0_56, %c640] : memref<128x1152xbf16, #tpu.memory_space<vmem>>, vector<128x128xbf16>
    tpu.vector_store %arg15[%c0_56, %c640], %82 {strides = array<i32>} : memref<128x1152xbf16, #tpu.memory_space<vmem>>, vector<128x128xbf16>,
    %c47 = arith.constant 47 : index
    %c0_57 = arith.constant 0 : index
    %84 = vector.load %arg14[%c47, %c0_57] : memref<192x128xbf16, #tpu.memory_space<vmem>>, vector<128x128xbf16>
    %c0_58 = arith.constant 0 : index
    %c768 = arith.constant 768 : index
    %85 = vector.load %arg15[%c0_58, %c768] : memref<128x1152xbf16, #tpu.memory_space<vmem>>, vector<128x128xbf16>
    tpu.vector_store %arg15[%c0_58, %c768], %84 {strides = array<i32>} : memref<128x1152xbf16, #tpu.memory_space<vmem>>, vector<128x128xbf16>,
    %c48 = arith.constant 48 : index
    %c0_59 = arith.constant 0 : index
    %86 = vector.load %arg12[%c48, %c0_59] : memref<192x128xbf16, #tpu.memory_space<vmem>>, vector<128x128xbf16>
    %c0_60 = arith.constant 0 : index
    %c896 = arith.constant 896 : index
    %87 = vector.load %arg15[%c0_60, %c896] : memref<128x1152xbf16, #tpu.memory_space<vmem>>, vector<128x128xbf16>
    tpu.vector_store %arg15[%c0_60, %c896], %86 {strides = array<i32>} : memref<128x1152xbf16, #tpu.memory_space<vmem>>, vector<128x128xbf16>,
    %c49 = arith.constant 49 : index
    %c0_61 = arith.constant 0 : index
    %88 = vector.load %arg13[%c49, %c0_61] : memref<192x128xbf16, #tpu.memory_space<vmem>>, vector<128x128xbf16>
    %c0_62 = arith.constant 0 : index
    %c1024 = arith.constant 1024 : index
    %89 = vector.load %arg15[%c0_62, %c1024] : memref<128x1152xbf16, #tpu.memory_space<vmem>>, vector<128x128xbf16>
    tpu.vector_store %arg15[%c0_62, %c1024], %88 {strides = array<i32>} : memref<128x1152xbf16, #tpu.memory_space<vmem>>, vector<128x128xbf16>,
    %c0_63 = arith.constant 0 : index
    %c0_64 = arith.constant 0 : index
    %90 = vector.load %arg15[%c0_63, %c0_64] : memref<128x1152xbf16, #tpu.memory_space<vmem>>, vector<128x1152xbf16>
    %c0_65 = arith.constant 0 : index
    %c0_66 = arith.constant 0 : index
    %91 = vector.load %arg7[%c0_65, %c0_66] : memref<1152x128xbf16, #tpu.memory_space<vmem>>, vector<1152x128xbf16>
    %cst_67 = arith.constant dense<0.000000e+00> : vector<128x128xf32>
    %92 = tpu.matmul %90, %91, %cst_67 {dimension_numbers = #tpu.dot_dimension_numbers<[1], [0], [0], [1], [0, 0, 1, 1], [], []>} : vector<128x1152xbf16>, vector<1152x128xbf16>, vector<128x128xf32> -> vector<128x128xf32>
    %c0_68 = arith.constant 0 : index
    %c0_69 = arith.constant 0 : index
    %93 = vector.load %arg8[%c0_68, %c0_69] : memref<1x128xf32, #tpu.memory_space<vmem>>, vector<1x128xf32>
    %94 = vector.broadcast %93 : vector<1x128xf32> to vector<128x128xf32>
    %95 = arith.addf %92, %94 : vector<128x128xf32>
    %cst_70 = arith.constant 0.000000e+00 : f32
    %96 = vector.broadcast %cst_70 : f32 to vector<128x128xf32>
    %97 = arith.maximumf %95, %96 : vector<128x128xf32>
    %98 = arith.truncf %97 : vector<128x128xf32> to vector<128x128xbf16>
    %c0_71 = arith.constant 0 : index
    %c0_72 = arith.constant 0 : index
    %99 = vector.load %arg9[%c0_71, %c0_72] : memref<128x128xbf16, #tpu.memory_space<vmem>>, vector<128x128xbf16>
    %cst_73 = arith.constant dense<0.000000e+00> : vector<128x128xf32>
    %100 = tpu.matmul %98, %99, %cst_73 {dimension_numbers = #tpu.dot_dimension_numbers<[1], [0], [0], [1], [0, 0, 1, 1], [], []>} : vector<128x128xbf16>, vector<128x128xbf16>, vector<128x128xf32> -> vector<128x128xf32>
    %c0_74 = arith.constant 0 : index
    %c0_75 = arith.constant 0 : index
    %101 = vector.load %arg10[%c0_74, %c0_75] : memref<1x128xf32, #tpu.memory_space<vmem>>, vector<1x128xf32>
    %102 = vector.broadcast %101 : vector<1x128xf32> to vector<128x128xf32>
    %103 = arith.addf %100, %102 : vector<128x128xf32>
    %104 = arith.extf %2 : vector<128x128xbf16> to vector<128x128xf32>
    %105 = arith.addf %103, %104 : vector<128x128xf32>
    %cst_76 = arith.constant 0.000000e+00 : f32
    %106 = vector.broadcast %cst_76 : f32 to vector<128x128xf32>
    %107 = arith.maximumf %105, %106 : vector<128x128xf32>
    %108 = arith.truncf %107 : vector<128x128xf32> to vector<128x128xbf16>
    %109 = vector.shape_cast %108 : vector<128x128xbf16> to vector<8x16x128xbf16>
    %c0_77 = arith.constant 0 : index
    %c0_78 = arith.constant 0 : index
    %c0_79 = arith.constant 0 : index
    %c0_80 = arith.constant 0 : index
    %110 = vector.load %arg11[%c0_77, %c0_78, %c0_79, %c0_80] : memref<1x8x16x128xbf16, #tpu.memory_space<vmem>>, vector<1x8x16x128xbf16>
    %111 = vector.shape_cast %110 : vector<1x8x16x128xbf16> to vector<8x16x128xbf16>
    %112 = vector.shape_cast %109 : vector<8x16x128xbf16> to vector<1x8x16x128xbf16>
    tpu.vector_store %arg11[%c0_77, %c0_78, %c0_79, %c0_80], %112 {strides = array<i32>} : memref<1x8x16x128xbf16, #tpu.memory_space<vmem>>, vector<1x8x16x128xbf16>,
    return
  }
  func.func @transform_0(%arg0: i32, %arg1: i32) -> (i32, i32, i32, i32) {
    %c0_i32 = arith.constant 0 : i32
    %c0_i32_0 = arith.constant 0 : i32
    %c0_i32_1 = arith.constant 0 : i32
    return %arg0, %arg1, %c0_i32, %c0_i32_0 : i32, i32, i32, i32
  }
  func.func @transform_1(%arg0: i32, %arg1: i32) -> (i32, i32, i32, i32) {
    %c8_i32 = arith.constant 8 : i32
    %0 = arith.muli %arg1, %c8_i32 : i32
    %c1_i32 = arith.constant 1 : i32
    %1 = arith.subi %0, %c1_i32 : i32
    %c0_i32 = arith.constant 0 : i32
    %2 = arith.maxsi %1, %c0_i32 : i32
    %c0_i32_0 = arith.constant 0 : i32
    %c0_i32_1 = arith.constant 0 : i32
    %c0_i32_2 = arith.constant 0 : i32
    return %arg0, %2, %c0_i32_0, %c0_i32_1 : i32, i32, i32, i32
  }
  func.func @transform_2(%arg0: i32, %arg1: i32) -> (i32, i32, i32, i32) {
    %c1_i32 = arith.constant 1 : i32
    %0 = arith.addi %arg1, %c1_i32 : i32
    %c8_i32 = arith.constant 8 : i32
    %1 = arith.muli %0, %c8_i32 : i32
    %c15_i32 = arith.constant 15 : i32
    %2 = arith.minsi %1, %c15_i32 : i32
    %c0_i32 = arith.constant 0 : i32
    %c0_i32_0 = arith.constant 0 : i32
    %c0_i32_1 = arith.constant 0 : i32
    return %arg0, %2, %c0_i32, %c0_i32_0 : i32, i32, i32, i32
  }
  func.func @transform_3(%arg0: i32, %arg1: i32) -> (i32, i32) {
    %c0_i32 = arith.constant 0 : i32
    %c0_i32_0 = arith.constant 0 : i32
    %c0_i32_1 = arith.constant 0 : i32
    return %c0_i32, %c0_i32_0 : i32, i32
  }
  func.func @transform_4(%arg0: i32, %arg1: i32) -> (i32, i32) {
    %c0_i32 = arith.constant 0 : i32
    %c0_i32_0 = arith.constant 0 : i32
    %c0_i32_1 = arith.constant 0 : i32
    return %c0_i32, %c0_i32_0 : i32, i32
  }
  func.func @transform_5(%arg0: i32, %arg1: i32) -> (i32, i32) {
    %c0_i32 = arith.constant 0 : i32
    %c0_i32_0 = arith.constant 0 : i32
    %c0_i32_1 = arith.constant 0 : i32
    return %c0_i32, %c0_i32_0 : i32, i32
  }
  func.func @transform_6(%arg0: i32, %arg1: i32) -> (i32, i32) {
    %c0_i32 = arith.constant 0 : i32
    %c0_i32_0 = arith.constant 0 : i32
    %c0_i32_1 = arith.constant 0 : i32
    return %c0_i32, %c0_i32_0 : i32, i32
  }
  func.func @transform_7(%arg0: i32, %arg1: i32) -> (i32, i32) {
    %c0_i32 = arith.constant 0 : i32
    %c0_i32_0 = arith.constant 0 : i32
    %c0_i32_1 = arith.constant 0 : i32
    return %c0_i32, %c0_i32_0 : i32, i32
  }
  func.func @transform_8(%arg0: i32, %arg1: i32) -> (i32, i32) {
    %c0_i32 = arith.constant 0 : i32
    %c0_i32_0 = arith.constant 0 : i32
    %c0_i32_1 = arith.constant 0 : i32
    return %c0_i32, %c0_i32_0 : i32, i32
  }
  func.func @transform_9(%arg0: i32, %arg1: i32) -> (i32, i32, i32, i32) {
    %c0_i32 = arith.constant 0 : i32
    %c0_i32_0 = arith.constant 0 : i32
    %c0_i32_1 = arith.constant 0 : i32
    return %arg0, %arg1, %c0_i32, %c0_i32_0 : i32, i32, i32, i32
  }
}

</mosaic_0001>

<bundles_post_ra>
// kernel: bottleneck_forward.1
= control target key start
LH: loop header
LB: loop body
LE: loop exit
PB: predicated region body
PF: predicated region fallthrough
CT: control target
= control target key end

     0   :  { %s4554_s30 = smov 0   ;;  %s4556_s10 = smov 0   ;;  %s5703_s0 = inlined_call_operand.vmem [shape: bf16[2,16,16,128], index: 0, kind: input, shape index: {}, may-alias: {0,1,2}]   ;;  %s5704_s1 = inlined_call_operand.vmem [shape: bf16[2,16,16,128], index: 1, kind: input, shape index: {}, may-alias: {0,1,2}]   ;;  %s5705_s2 = inlined_call_operand.vmem [shape: bf16[2,16,16,128], index: 2, kind: input, shape index: {}, may-alias: {0,1,2}]   ;;  %s5706_s3 = inlined_call_operand.vmem [shape: bf16[128,128], index: 3, kind: input, shape index: {}]   ;;  %s5707_s4 = inlined_call_operand.vmem [shape: f32[1,128], index: 4, kind: input, shape index: {}]   ;;  %s5708_s5 = inlined_call_operand.vmem [shape: bf16[1152,128], index: 5, kind: input, shape index: {}]   ;;  %s5709_s6 = inlined_call_operand.vmem [shape: f32[1,128], index: 6, kind: input, shape index: {}]   ;;  %s5710_s7 = inlined_call_operand.vmem [shape: bf16[128,128], index: 7, kind: input, shape index: {}]   ;;  %s5711_s8 = inlined_call_operand.vmem [shape: f32[1,128], index: 8, kind: input, shape index: {}]   ;;  %s5712_s9 = inlined_call_operand.vmem [shape: bf16[2,16,16,128], index: 9, kind: output, shape index: {}]  }
   0x1   :  { %s4558_s11 = smov 0   ;;  %s4560_s12 = smov 0  }
   0x2   :  { %s4562_s13 = smov 0  }
   0x3 LB: > { %s28_s14 = sadd.s32 1, %s4493_s11  ;;  %s31_s15 = sadd.s32 1, %s4497_s12  ;;  %s4501_s13 = sphi %s4562_s13, %s19_s13   ;;  %s4497_s12 = sphi %s4560_s12, %s5763_s12   ;;  %s4493_s11 = sphi %s4558_s11, %s5762_s11   ;;  %s4489_s10 = sphi %s4556_s10, %s5761_s10   ;;  %s4485_s30 = sphi %s4554_s30, %s5760_s30  }
   0x4   : > { %p29_p0 = scmp.ge.s32.totalorder %s28_s14, 2  ;;  %p3660_p1 = scmp.ge.s32.totalorder %s4501_s13, 1 }
   0x5   : > { %p373_p2 = scmp.lt.s32.totalorder %s4501_s13, 5 }
   0x6   : > { %s5765_s14 = smov (%p29_p0, %s28_s14), 0  ;;  %s5767_s15 = smov (!%p29_p0, %s31_s15), %s4497_s12 }
   0x7   : > { %p374_p3 = pnand %p3660_p1, %p373_p2  ;;  %p33_p4 = scmp.ge.s32.totalorder %s5767_s15, 2 }
   0x8   : > { %v4349_v0 = vld [vmem:[%s5706_s3] sm:$0xff] (!%p374_p3)   ;;  %s4590_s18 = sshll.u32 (!%p374_p3), %s4485_s30, 3  ;;  %v4350_v1 = vld [vmem:[%s5706_s3 + $0x8] sm:$0xff] (!%p374_p3)   ;;  %p446_p5 = scmp.lt.s32.totalorder (!%p374_p3), %s4489_s10, 1  ;;  %v4351_v2 = vld [vmem:[%s5706_s3 + $0x10] sm:$0xff] (!%p374_p3)   ;;  %v4503_v38 = vmov (!%p374_p3), 0   ;;  %v786_v53 = vlaneseq (!%p374_p3) }
   0x9   : > { %s5769_s15 = smov (%p33_p4, %s5767_s15), 0  ;;  %377 = sbr.rel (%p374_p3) target bundleno = 872 (0x368), region = 56 }
   0xa   : > { %4192 = vmatprep.subr.bf16.mxu0 (!%p374_p3), %v4349_v0  ;;  %p448_p6 = scmp.lt.s32.totalorder (!%p374_p3), %s4590_s18, 15  ;;  %s3666_s24 = sadd.s32 (!%p374_p3), 4294967295, %s4590_s18  ;;  %v4352_v3 = vld [vmem:[%s5706_s3 + $0x18] sm:$0xff] (!%p374_p3)   ;;  %v4367_v4 = vld [vmem:[%s5708_s5 + $0x40] sm:$0xff] (!%p374_p3)   ;;  %v4371_v7 = vld [vmem:[%s5708_s5 + $0x48] sm:$0xff] (!%p374_p3)   ;;  %1429 = vst [vmem:[#allocation4] sm:$0xff] (!%p374_p3), %v4503_v38 }
   0xb   : > { %4193 = vmatpush3.bf16.msra.mxu0 (!%p374_p3), %v4349_v0  ;;  %p458_p7 = scmp.gt.s32.totalorder (!%p374_p3), %s3666_s24, 0  ;;  %p3667_p8 = scmp.lt.s32.totalorder (!%p374_p3), %s3666_s24, 15  ;;  %3904 = vmatprep.subr.bf16.mxu1 (!%p374_p3), %v4367_v4  ;;  %v4353_v5 = vld [vmem:[%s5706_s3 + $0x20] sm:$0xff] (!%p374_p3)   ;;  %v4354_v8 = vld [vmem:[%s5706_s3 + $0x28] sm:$0xff] (!%p374_p3)   ;;  %v4355_v11 = vld [vmem:[%s5706_s3 + $0x30] sm:$0xff] (!%p374_p3)   ;;  %1418 = vst [vmem:[#allocation3 + $0x58] sm:$0xff] (!%p374_p3), %v4503_v38 }
   0xc   : > { %4194 = vmatprep.subr.bf16.mxu0 (!%p374_p3), %v4350_v1  ;;  %s3812_s16 = sadd.s32 (!%p374_p3), 8, %s4590_s18  ;;  %v4369_v6 = vld [vmem:[%s5708_s5] sm:$0xff] (!%p374_p3)   ;;  %v4373_v9 = vld [vmem:[%s5708_s5 + $0x8] sm:$0xff] (!%p374_p3)   ;;  %v4356_v12 = vld [vmem:[%s5706_s3 + $0x38] sm:$0xff] (!%p374_p3)   ;;  %v787_v54 = vshrl.u32 (!%p374_p3), %v786_v53, 7  ;;  %p1047_p10 = scmp.eq.s32.totalorder (!%p374_p3), %s4485_s30, 0 }
   0xd   : > { %p4616_p9 = scmp.lt.s32.totalorder (!%p374_p3), %s3812_s16, 15  ;;  %3905 = vmatpush3.bf16.msra.mxu1 (!%p374_p3), %v4369_v6  ;;  %v4368_v15 = vld [vmem:[%s5708_s5 + $0xc0] sm:$0xff] (!%p374_p3)   ;;  %v4372_v17 = vld [vmem:[%s5708_s5 + $0xc8] sm:$0xff] (!%p374_p3)   ;;  %v4375_v26 = vld [vmem:[%s5708_s5 + $0x50] sm:$0xff] (!%p374_p3)   ;;  %p1091_p11 = scmp.eq.s32.totalorder (!%p374_p3), %s4485_s30, 1 }
   0xe   : > { %3906 = vmatprep.subr.bf16.mxu1 (!%p374_p3), %v4371_v7  ;;  %v4370_v16 = vld [vmem:[%s5708_s5 + $0x80] sm:$0xff] (!%p374_p3)   ;;  %v4374_v19 = vld [vmem:[%s5708_s5 + $0x88] sm:$0xff] (!%p374_p3)   ;;  %v4377_v27 = vld [vmem:[%s5708_s5 + $0x10] sm:$0xff] (!%p374_p3)   ;;  %v789_v55 = vadd.s32 (!%p374_p3), 16, %v787_v54  ;;  %v790_v56 = vadd.s32 (!%p374_p3), 24, %v787_v54  ;;  %v788_v57 = vadd.s32 (!%p374_p3), 8, %v787_v54 }
   0xf   : > { %4195 = vmatpush3.bf16.msra.mxu0 (!%p374_p3), %v4350_v1  ;;  %v4379_v28 = vld [vmem:[%s5708_s5 + $0x58] sm:$0xff] (!%p374_p3)   ;;  %v4376_v30 = vld [vmem:[%s5708_s5 + $0xd0] sm:$0xff] (!%p374_p3)   ;;  %v4383_v32 = vld [vmem:[%s5708_s5 + $0x60] sm:$0xff] (!%p374_p3)   ;;  %v811_v59 = vand.u32 (!%p374_p3), 15, %v787_v54  ;;  %v793_v0 = vadd.s32 (!%p374_p3), 48, %v787_v54  ;;  %v791_v1 = vadd.s32 (!%p374_p3), 32, %v787_v54 }
  0x10   : > { %s5771_s10 = smov (!%p446_p5, %s4489_s10), 1  ;;  %4196 = vmatprep.subr.bf16.mxu0 %v4351_v2  ;;  %s5773_s24 = smov (!%p458_p7, %s3666_s24), 0  ;;  %v4381_v29 = vld [vmem:[%s5708_s5 + $0x18] sm:$0xff]   ;;  %v4378_v31 = vld [vmem:[%s5708_s5 + $0x90] sm:$0xff]   ;;  %v4385_v33 = vld [vmem:[%s5708_s5 + $0x20] sm:$0xff]   ;;  %v825_v58 = vand.u32 15, %v789_v55 }
  0x11   : > { %s449_s23 = scalar_select %p448_p6, %s4590_s18, 15  ;;  %3907 = vmatpush3.bf16.msra.mxu1 %v4373_v9  ;;  %v4380_v34 = vld [vmem:[%s5708_s5 + $0xd8] sm:$0xff]   ;;  %v4387_v36 = vld [vmem:[%s5708_s5 + $0x68] sm:$0xff]   ;;  %v4384_v39 = vld [vmem:[%s5708_s5 + $0xe0] sm:$0xff]   ;;  %v832_v61 = vand.u32 15, %v790_v56  ;;  %v818_v63 = vand.u32 15, %v788_v57 }
  0x12   : > { %s4607_s29 = sshll.u32 %s5771_s10, 5  ;;  %s5775_s24 = smov (!%p3667_p8, %s5773_s24), 15  ;;  %3908 = vmatprep.subr.bf16.mxu1 %v4375_v26  ;;  %v4382_v35 = vld [vmem:[%s5708_s5 + $0x98] sm:$0xff]   ;;  %v4389_v37 = vld [vmem:[%s5708_s5 + $0x28] sm:$0xff]   ;;  %v4386_v40 = vld [vmem:[%s5708_s5 + $0xa0] sm:$0xff]   ;;  %vm4760_vm0 = vcmp.eq.s32.totalorder %v825_v58, 0 }
  0x13   : > { %4197 = vmatpush3.bf16.msra.mxu0 %v4351_v2  ;;  %s3662_s20 = sshll.u32 %s449_s23, 1  ;;  %s3672_s25 = sshll.u32 %s5775_s24, 1  ;;  %v4391_v41 = vld [vmem:[%s5708_s5 + $0x70] sm:$0xff]   ;;  %v4388_v43 = vld [vmem:[%s5708_s5 + $0xe8] sm:$0xff]   ;;  %v4395_v45 = vld [vmem:[%s5708_s5 + $0x78] sm:$0xff]   ;;  %v792_v4 = vadd.s32 40, %v787_v54 }
  0x14   : > { %4198 = vmatprep.subr.bf16.mxu0 %v4352_v3  ;;  %s466_s10 = sadd.s32 %s3672_s25, %s4607_s29  ;;  %s4628_s17 = sadd.s32 %s4607_s29, %s3662_s20  ;;  %v4393_v42 = vld [vmem:[%s5708_s5 + $0x30] sm:$0xff]   ;;  %v4390_v44 = vld [vmem:[%s5708_s5 + $0xa8] sm:$0xff]   ;;  %v4397_v46 = vld [vmem:[%s5708_s5 + $0x38] sm:$0xff]   ;;  %v4768_v6 = vadd.s32 80, %v787_v54  ;;  %v4770_v7 = vadd.s32 64, %v787_v54  ;;  %vm4772_vm2 = vcmp.eq.s32.totalorder %v811_v59, 0 }
  0x15   : > { %s3674_s24 = sshll.u32 %s466_s10, 2  ;;  %s5777_s16 = smov (!%p4616_p9, %s3812_s16), 15  ;;  %3909 = vmatpush3.bf16.msra.mxu1 %v4377_v27  ;;  %v4392_v47 = vld [vmem:[%s5708_s5 + $0xf0] sm:$0xff]   ;;  %v4396_v49 = vld [vmem:[%s5708_s5 + $0xf8] sm:$0xff]   ;;  %v4399_v51 = vld [vmem:[%s5708_s5 + $0x140] sm:$0xff]   ;;  %vm4776_vm3 = vcmp.eq.s32.totalorder %v832_v61, 15 }
  0x16   : > { %s468_s22 = scalar_lea.vmem %s5704_s1, %s3674_s24  ;;  %s3664_s27 = sshll.u32 %s4628_s17, 2  ;;  %3910 = vmatprep.subr.bf16.mxu1 %v4379_v28  ;;  %v4394_v48 = vld [vmem:[%s5708_s5 + $0xb0] sm:$0xff]   ;;  %v4398_v50 = vld [vmem:[%s5708_s5 + $0xb8] sm:$0xff]   ;;  %v4407_v52 = vld [vmem:[%s5708_s5 + $0x1c0] sm:$0xff]   ;;  %vm4790_vm4 = vcmp.eq.s32.totalorder %v818_v63, 15  ;;  %v4804_v26 = vadd.s32 104, %v787_v54 }
  0x17   : > { %4199 = vmatpush3.bf16.msra.mxu0 %v4352_v3  ;;  %v4357_v10 = vld [vmem:[%s468_s22] sm:$0xff]   ;;  %s5779_s16 = smov (!%p4616_p9, %s5777_s16), 15  ;;  %s4649_s24 = scalar_lea.vmem %s5703_s0, %s3664_s27  ;;  %v794_v3 = vadd.s32 56, %v787_v54  ;;  %vm1560_vm10 = vsmask.f32 7424 }
  0x18   : > { %4200 = vmatprep.subr.bf16.mxu0 %v4353_v5  ;;  %4208 = vmatprep.mubr.bf16.mxu0 %v4357_v10  ;;  %s3679_s19 = sshll.u32 %s5779_s16, 1  ;;  %v502_v13 = vld [vmem:[%s4649_s24] sm:$0xff]   ;;  %v504_v14 = vld [vmem:[%s4649_s24 + $0x8] sm:$0xff]   ;;  %v506_v18 = vld [vmem:[%s4649_s24 + $0x10] sm:$0xff]   ;;  %vm1450_vm12 = vsmask.f32 256  ;;  %s5661_s20 = scalar_lea.vmem %s5712_s9, %s3664_s27 }
  0x19   : > { %s483_s21 = sadd.s32 %s3679_s19, %s4607_s29  ;;  %v508_v20 = vld [vmem:[%s4649_s24 + $0x18] sm:$0xff]   ;;  %v510_v21 = vld [vmem:[%s4649_s24 + $0x20] sm:$0xff]   ;;  %v512_v22 = vld [vmem:[%s4649_s24 + $0x28] sm:$0xff]   ;;  %3911 = vmatpush3.bf16.msra.mxu1 %v4381_v29 }
  0x1a   : > { %s4655_s26 = sshll.u32 %s483_s21, 2  ;;  %v514_v23 = vld [vmem:[%s4649_s24 + $0x30] sm:$0xff]   ;;  %v516_v24 = vld [vmem:[%s4649_s24 + $0x38] sm:$0xff]   ;;  %3912 = vmatprep.subr.bf16.mxu1 %v4383_v32  ;;  %v1441_v62 = vld [vmem:[#allocation4] sm:$0x80] }
  0x1b   : > { %4201 = vmatpush3.bf16.msra.mxu0 %v4353_v5  ;;  %s485_s23 = scalar_lea.vmem %s5705_s2, %s4655_s26 }
  0x1c   : > { %4202 = vmatprep.subr.bf16.mxu0 %v4354_v8  ;;  %v4366_v25 = vld [vmem:[%s485_s23] sm:$0xff]   ;;  %s1068_s16 = scalar_select %p1047_p10, 1, 0 }
  0x1d   : > { %3913 = vmatpush3.bf16.msra.mxu1 %v4385_v33  ;;  %s4813_s19 = scalar_select %p1091_p11, 1, 0 }
  0x1e   : > { %3914 = vmatprep.subr.bf16.mxu1 %v4387_v36  ;;  %v1069_v60 = vstv %s1068_s16  ;;  %v4821_v36 = vadd.s32 128, %v787_v54 }
  0x1f   : > { %4203 = vmatpush3.bf16.msra.mxu0 %v4354_v8  ;;  %vm4764_vm1 = vcmp.eq.s32.totalorder %v1069_v60, 1  ;;  %v1452_v8 = vshrl.u32 %v1441_v62, 16  ;;  %v1113_v53 = vstv %s4813_s19 }
  0x20   : > { %4204 = vmatprep.subr.bf16.mxu0 %v4355_v11  ;;  %vm3876_vm8 = vmneg %vm4764_vm1  ;;  %v923_v57 = vand.u32 15, %v4821_v36 }
  0x21   : > { %3915 = vmatpush3.bf16.msra.mxu1 %v4389_v37  ;;  %v4823_v37 = vadd.s32 152, %v787_v54  ;;  %vm4864_vm11 = vmpackc.low %vm3876_vm8, %vm3876_vm8 }
  0x22   : > { %3916 = vmatprep.subr.bf16.mxu1 %v4391_v41 }
  0x23   : > { %4205 = vmatpush3.bf16.msra.mxu0 %v4355_v11  ;;  %v4780_v11 = vadd.s32 88, %v787_v54 }
  0x24   : > { %4206 = vmatprep.subr.bf16.mxu0 %v4356_v12 }
  0x25   : > { %3917 = vmatpush3.bf16.msra.mxu1 %v4393_v42  ;;  %v888_v29 = vand.u32 15, %v4780_v11 }
  0x26   : > { %3918 = vmatprep.subr.bf16.mxu1 %v4395_v45 }
  0x27   : > { %4207 = vmatpush3.bf16.msra.mxu0 %v4356_v12  ;;  %v4782_v12 = vadd.s32 72, %v787_v54  ;;  %vm4899_vm15 = vcmp.eq.s32.totalorder %v888_v29, 15 }
  0x28   : > { %3968 = vmatprep.subr.bf16.mxu0 %v4368_v15  ;;  %v853_v15 = vand.u32 15, %v793_v0 }
  0x29   : > { %3919 = vmatpush3.bf16.msra.mxu1 %v4397_v46 }
  0x2a   : > { %4209 = vmatmul.mubr.bf16.vlgmr.msra.gmra.mrb[0].mxu0 %v502_v13  ;;  %4032 = vmatprep.subr.bf16.mxu1 %v4399_v51  ;;  %v4788_v13 = vld [vmem:[%s5707_s4] ss:$0 sm:$0xff]  ;;  %vm4816_vm5 = vcmp.eq.s32.totalorder %v853_v15, 0 }
  0x2b   : > { %4212 = vmatprep.mubr.bf16.mxu0 %v504_v14  ;;  %3969 = vmatpush3.bf16.msra.mxu0 %v4370_v16  ;;  %v839_v16 = vand.u32 15, %v791_v1 }
  0x2c   : > { %3970 = vmatprep.subr.bf16.mxu0 %v4372_v17  ;;  %v4794_v17 = vadd.s32 112, %v787_v54 }
  0x2d   : > { %vm4826_vm6 = vcmp.eq.s32.totalorder %v839_v16, 0 }
  0x2f   : > { %3971 = vmatpush3.bf16.msra.mxu0 %v4374_v19  ;;  %v846_v19 = vand.u32 15, %v792_v4 }
  0x30   : > { %3972 = vmatprep.subr.bf16.mxu0 %v4376_v30  ;;  %v874_v30 = vand.u32 15, %v4782_v12 }
  0x31   : > { %vm4844_vm9 = vcmp.eq.s32.totalorder %v846_v19, 15 }
  0x32   : > { %4213 = vmatmul.mubr.bf16.gmra.mrb[4].mxu0 %v506_v18  ;;  %v860_v18 = vand.u32 15, %v794_v3 }
  0x33   : > { %4216 = vmatprep.mubr.bf16.mxu0 %v508_v20  ;;  %3973 = vmatpush3.bf16.msra.mxu0 %v4378_v31  ;;  %v4796_v20 = vadd.s32 96, %v787_v54  ;;  %v4809_v31 = vadd.s32 144, %v787_v54 }
  0x34   : > { %3974 = vmatprep.subr.bf16.mxu0 %v4380_v34  ;;  %vm4833_vm7 = vcmp.eq.s32.totalorder %v860_v18, 15  ;;  %v4402_v18 = vld [vmem:[%s5708_s5 + $0x108] sm:$0xff]  }
  0x35   : > { %v895_v42 = vand.u32 15, %v4796_v20 }
  0x37   : > { %3975 = vmatpush3.bf16.msra.mxu0 %v4382_v35  ;;  %v909_v35 = vand.u32 15, %v4794_v17 }
  0x38   : > { %3976 = vmatprep.subr.bf16.mxu0 %v4384_v39 }
  0x3a   : > { %4217 = vmatmul.mubr.bf16.gmra.mrb[8].mxu0 %v510_v21  ;;  %v4798_v21 = vadd.s32 120, %v787_v54 }
  0x3b   : > { %4220 = vmatprep.mubr.bf16.mxu0 %v512_v22  ;;  %3977 = vmatpush3.bf16.msra.mxu0 %v4386_v40 }
  0x3c   : > { %3978 = vmatprep.subr.bf16.mxu0 %v4388_v43  ;;  %v916_v43 = vand.u32 15, %v4798_v21 }
  0x3f   : > { %3979 = vmatpush3.bf16.msra.mxu0 %v4390_v44 }
  0x40   : > { %3980 = vmatprep.subr.bf16.mxu0 %v4392_v47  ;;  %v902_v47 = vand.u32 15, %v4804_v26 }
  0x42   : > { %4221 = vmatmul.mubr.bf16.gmra.mrb[12].mxu0 %v514_v23  ;;  %v881_v23 = vand.u32 15, %v4768_v6 }
  0x43   : > { %4224 = vmatprep.mubr.bf16.mxu0 %v516_v24  ;;  %3981 = vmatpush3.bf16.msra.mxu0 %v4394_v48  ;;  %v867_v24 = vand.u32 15, %v4770_v7  ;;  %v4840_v48 = vadd.s32 136, %v787_v54  ;;  %v944_v54 = vand.u32 15, %v4823_v37 }
  0x44   : > { %3982 = vmatprep.subr.bf16.mxu0 %v4396_v49  ;;  %vm4881_vm13 = vcmp.eq.s32.totalorder %v881_v23, 0 }
  0x45   : > { %v930_v3 = vand.u32 15, %v4840_v48  ;;  %vm4890_vm14 = vcmp.eq.s32.totalorder %v867_v24, 0  ;;  %vm5108_vm8 = vcmp.eq.s32.totalorder %v944_v54, 15  ;;  %v4409_v54 = vld [vmem:[%s5708_s5 + $0x160] sm:$0xff]  }
  0x47   : > { %3983 = vmatpush3.bf16.msra.mxu0 %v4398_v50 }
  0x48   : > { %4096 = vmatprep.subr.bf16.mxu0 %v4407_v52  ;;  %v937_v52 = vand.u32 15, %v4809_v31 }
  0x4a   : > { %4225 = vmatmul.mubr.bf16.gmra.mrb[16].mxu0 %v4366_v25  ;;  %v4802_v25 = vrot.slane %v1452_v8, 7 }
  0xfd   : > { %v4210_v22 = vpop.f32.mrb[0].mxu0 }
  0xfe   : > { %v696_v27 = vadd.f32 %v4210_v22, %v4788_v13  ;;  %v687_v28 = vpop.f32.mrb[1].mxu0 }
  0xff   : > { %v688_v32 = vadd.f32 %v4788_v13, %v687_v28  ;;  %v4211_v33 = vpop.f32.mrb[2].mxu0 }
 0x100   : > { %v768_v38 = vmax.f32 %v696_v27, 0.0  ;;  %v699_v39 = vadd.f32 %v4211_v33, %v4788_v13  ;;  %v690_v40 = vpop.f32.mrb[3].mxu0 }
 0x101   : > { %v766_v44 = vmax.f32 %v688_v32, 0.0  ;;  %v691_v45 = vadd.f32 %v4788_v13, %v690_v40 }
 0x102   : > { %v1287_v49 = vsel %vm4760_vm0, 0.0, %v768_v38  ;;  %v769_v50 = vmax.f32 %v699_v39, 0.0  ;;  %vm4912_vm0 = vcmp.eq.s32.totalorder %v874_v30, 15 }
 0x103   : > { %v1195_v55 = vsel %vm4764_vm1, 0.0, %v766_v44  ;;  %v767_v56 = vmax.f32 %v691_v45, 0.0 }
 0x104   : > { %v1285_v58 = vsel %vm4772_vm2, 0.0, %v1195_v55  ;;  %v4856_v59 = vpack.c.bf16 %v769_v50, %v1287_v49  ;;  %v1378_v60 = vsel %vm4776_vm3, 0.0, %v769_v50  ;;  %v4868_v62 = vpack.c.bf16 %v769_v50, %v768_v38 }
 0x105   : > { %v1396_v63 = vpack.c.bf16 %v1378_v60, %v768_v38  ;;  %v1196_v0 = vsel %vm4764_vm1, 0.0, %v767_v56  ;;  %v4214_v1 = vpop.f32.mrb[4].mxu0  ;;  %v3879_v2 = vpack.c.bf16 %v767_v56, %v766_v44  ;;  %vm4948_vm1 = vcmp.eq.s32.totalorder %v909_v35, 0 }
 0x106   : > { %1420 = vst [vmem:[#allocation3 + $0x10] sm:$0xff] %v4856_v59  ;;  %v1305_v4 = vpack.c.bf16 %v1196_v0, %v1285_v58  ;;  %v1376_v6 = vsel %vm4790_vm4, 0.0, %v1196_v0  ;;  %v712_v8 = vadd.f32 %v4214_v1, %v4788_v13  ;;  %v703_v9 = vpop.f32.mrb[5].mxu0  ;;  %v1569_v10 = vshll.u32 %v4856_v59, 16 }
 0x107   : > { %1432 = vst [vmem:[#allocation4 + $0x10] sm:$0xff] %v1396_v63  ;;  %v1395_v15 = vpack.c.bf16 %v1376_v6, %v1195_v55  ;;  %v704_v5 = vadd.f32 %v4788_v13, %v703_v9  ;;  %v4215_v16 = vpop.f32.mrb[6].mxu0  ;;  %3880 = vmatprep.mubr.msk.bf16.mxu1 %vm4864_vm11, %v3879_v2  ;;  %v1659_v19 = vshrl.u32 %v1396_v63, 16  ;;  %v1662_v14 = vshll.u32 %v1396_v63, 16  ;;  %v4400_v9 = vld [vmem:[%s5708_s5 + $0x100] sm:$0xff]  }
 0x108   : > { %v4885_v22 = vmax.f32 %v712_v8, 0.0  ;;  %v715_v27 = vadd.f32 %v4215_v16, %v4788_v13  ;;  %v706_v28 = vpop.f32.mrb[7].mxu0  ;;  %v1562_v33 = vshrl.u32 %v1305_v4, 16  ;;  %v1564_v38 = vshll.u32 %v1305_v4, 16 }
 0x109   : > { %1431 = vst [vmem:[#allocation4 + $0x8] sm:$0xff] %v1395_v15  ;;  %v4894_v23 = vmax.f32 %v704_v5, 0.0  ;;  %v707_v39 = vadd.f32 %v4788_v13, %v706_v28  ;;  %v4903_v44 = vrot.slane %v1659_v19, 7  ;;  %v1571_v7 = vrot.slane %v1569_v10, 1  ;;  %v4406_v10 = vld [vmem:[%s5708_s5 + $0x118] sm:$0xff]  }
 0x10a   : > { %v1291_v24 = vsel %vm4816_vm5, 0.0, %v4885_v22  ;;  %v4908_v45 = vmax.f32 %v715_v27, 0.0  ;;  %v1566_v11 = vrot.slane %v1564_v38, 1  ;;  %v1456_v29 = vshrl.u32 %v1395_v15, 16 }
 0x10b   : > { %v1289_v50 = vsel %vm4826_vm6, 0.0, %v4894_v23  ;;  %v771_v55 = vmax.f32 %v707_v39, 0.0  ;;  %v4920_v56 = vor.u32 %v1662_v14, %v4903_v44  ;;  %v1459_v34 = vshll.u32 %v1395_v15, 16  ;;  %v4401_v15 = vld [vmem:[%s5708_s5 + $0x148] sm:$0xff]  }
 0x10c   : > { %v4923_v58 = vpack.c.bf16 %v4908_v45, %v1291_v24  ;;  %v1382_v12 = vsel %vm4833_vm7, 0.0, %v4908_v45  ;;  %v1567_v30 = vor.u32 %v1566_v11, %v1562_v33  ;;  %v1458_v60 = vrot.slane %v1456_v29, 7 }
 0x10d   : > { %v4929_v61 = vpack.c.bf16 %v1382_v12, %v4885_v22  ;;  %v4931_v63 = vpack.c.bf16 %v771_v55, %v1289_v50  ;;  %v1380_v41 = vsel %vm4844_vm9, 0.0, %v771_v55  ;;  %v4218_v0 = vpop.f32.mrb[8].mxu0  ;;  %v1573_v1 = vshrl.u32 %v4856_v59, 16 }
 0x10e   : > { %1422 = vst [vmem:[#allocation3 + $0x20] sm:$0xff] %v4923_v58  ;;  %v1397_v2 = vpack.c.bf16 %v1380_v41, %v4894_v23  ;;  %v728_v46 = vadd.f32 %v4218_v0, %v4788_v13  ;;  %v719_v4 = vpop.f32.mrb[9].mxu0  ;;  %v1572_v6 = vsel %vm1560_vm10, %v1567_v30, %v1571_v7  ;;  %v1461_v8 = vor.u32 %v1459_v34, %v1458_v60 }
 0x10f   : > { %1434 = vst [vmem:[#allocation4 + $0x20] sm:$0xff] %v4929_v61  ;;  %1421 = vst [vmem:[#allocation3 + $0x18] sm:$0xff] %v4931_v63  ;;  %v720_v51 = vadd.f32 %v4788_v13, %v719_v4  ;;  %v4219_v59 = vpop.f32.mrb[10].mxu0  ;;  %v4957_v5 = vsel %vm1450_vm12, %v1458_v60, %v4920_v56  ;;  %v1575_v16 = vor.u32 %v1573_v1, %v1571_v7  ;;  %v1577_v19 = vshll.u32 %v4931_v63, 16 }
 0x110   : > { %1433 = vst [vmem:[#allocation4 + $0x18] sm:$0xff] %v1397_v2  ;;  %v4960_v14 = vmax.f32 %v728_v46, 0.0  ;;  %v731_v17 = vadd.f32 %v4219_v59, %v4788_v13  ;;  %v722_v35 = vpop.f32.mrb[11].mxu0  ;;  %v1645_v27 = vld [vmem:[#allocation4 + $0x8] sm:$0x80]  ;;  %v1462_v28 = vsel %vm1450_vm12, %v4802_v25, %v1461_v8  ;;  %vm4967_vm2 = vcmp.eq.s32.totalorder %v895_v42, 0 }
 0x111   : > { %v1667_v38 = vshrl.u32 %v1397_v2, 16  ;;  %v4971_v39 = vmax.f32 %v720_v51, 0.0  ;;  %v723_v7 = vadd.f32 %v4788_v13, %v722_v35  ;;  %v1655_v24 = vshrl.u32 %v1645_v27, 16  ;;  %2737 = vmatmul.mubr.bf16.vlgmr.msra.gmra.mrb[0].mxu1 %v1462_v28  ;;  %v4411_v46 = vld [vmem:[%s5708_s5 + $0x1c8] sm:$0xff]   ;;  %v4404_v51 = vld [vmem:[%s5708_s5 + $0x110] sm:$0xff]   ;;  %v4405_v35 = vld [vmem:[%s5708_s5 + $0x158] sm:$0xff]  }
 0x112   : > { %vm4976_vm3 = vcmp.eq.s32.totalorder %v916_v43, 15  ;;  %v1670_v25 = vshll.u32 %v1397_v2, 16  ;;  %v1295_v20 = vsel %vm4881_vm13, 0.0, %v4960_v14  ;;  %v4983_v42 = vmax.f32 %v731_v17, 0.0  ;;  %4033 = vmatpush3.bf16.msra.mxu1 %v4400_v9  ;;  %2744 = vmatprep.mubr.bf16.mxu1 %v4868_v62 }
 0x113   : > { %vm4988_vm4 = vcmp.eq.s32.totalorder %v902_v47, 15  ;;  %v4992_v21 = vrot.slane %v1667_v38, 7  ;;  %v4994_v43 = vrot.slane %v1577_v19, 1  ;;  %v1293_v50 = vsel %vm4890_vm14, 0.0, %v4971_v39  ;;  %4034 = vmatprep.subr.bf16.mxu1 %v4401_v15  ;;  %v4403_v47 = vld [vmem:[%s5708_s5 + $0x150] sm:$0xff]  }
 0x114   : > { %v5002_v34 = vmax.f32 %v723_v7, 0.0  ;;  %v1657_v12 = vrot.slane %v1655_v24, 7  ;;  %v5005_v26 = vpack.c.bf16 %v771_v55, %v4894_v23  ;;  %v5011_v30 = vpack.c.bf16 %v4983_v42, %v1295_v20  ;;  %v4408_v23 = vld [vmem:[%s5708_s5 + $0x180] sm:$0xff]   ;;  %v4412_v7 = vld [vmem:[%s5708_s5 + $0x188] sm:$0xff]  }
 0x115   : > { %v1386_v60 = vsel %vm4899_vm15, 0.0, %v4983_v42  ;;  %v1672_v32 = vor.u32 %v1670_v25, %v4992_v21  ;;  %v5019_v41 = vsel %vm1560_vm10, %v1575_v16, %v4994_v43  ;;  %v4222_v2 = vpop.f32.mrb[12].mxu0  ;;  %v1678_v16 = vshll.u32 %v4929_v61, 16 }
 0x116   : > { %v5025_v55 = vpack.c.bf16 %v1386_v60, %v4960_v14  ;;  %v5028_v0 = vpack.c.bf16 %v5002_v34, %v1293_v50  ;;  %v1384_v40 = vsel %vm4912_vm0, 0.0, %v5002_v34  ;;  %v1665_v1 = vsel %vm1450_vm12, %v1657_v12, %v4920_v56  ;;  %1424 = vst [vmem:[#allocation3 + $0x30] sm:$0xff] %v5011_v30  ;;  %v735_v9 = vpop.f32.mrb[13].mxu0  ;;  %4035 = vmatpush3.bf16.msra.mxu1 %v4402_v18  ;;  %v4420_v18 = vld [vmem:[%s5708_s5 + $0x130] sm:$0xff]  }
 0x117   : > { %v5040_v4 = vpack.c.bf16 %v1384_v40, %v4971_v39  ;;  %2833 = vmatprep.mubr.bf16.mxu0 %v1665_v1  ;;  %v744_v8 = vadd.f32 %v4222_v2, %v4788_v13  ;;  %v5045_v49 = vsel %vm1450_vm12, %v4903_v44, %v1672_v32  ;;  %v1675_v56 = vshrl.u32 %v4929_v61, 16  ;;  %v4223_v15 = vpop.f32.mrb[14].mxu0  ;;  %4036 = vmatprep.subr.bf16.mxu1 %v4403_v47  ;;  %v4416_v32 = vld [vmem:[%s5708_s5 + $0x190] sm:$0xff]   ;;  %v4417_v2 = vld [vmem:[%s5708_s5 + $0x1d8] sm:$0xff]  }
 0x118   : > { %1436 = vst [vmem:[#allocation4 + $0x30] sm:$0xff] %v5025_v55  ;;  %1423 = vst [vmem:[#allocation3 + $0x28] sm:$0xff] %v5028_v0  ;;  %2834 = vmatmul.mubr.bf16.vlgmr.msra.gmra.mrb[20].mxu0 %v1572_v6  ;;  %v736_v59 = vadd.f32 %v4788_v13, %v735_v9  ;;  %vm5057_vm5 = vcmp.eq.s32.totalorder %v1113_v53, 1  ;;  %v1581_v19 = vshrl.u32 %v4931_v63, 16  ;;  %v1585_v17 = vshll.u32 %v4923_v58, 16  ;;  %v738_v28 = vpop.f32.mrb[15].mxu0 }
 0x119   : > { %v5066_v6 = vmax.f32 %v744_v8, 0.0  ;;  %v747_v27 = vadd.f32 %v4223_v15, %v4788_v13  ;;  %2841 = vmatprep.mubr.bf16.mxu0 %v5045_v49  ;;  %v1677_v61 = vrot.slane %v1675_v56, 7  ;;  %vm5072_vm6 = vcmp.eq.s32.totalorder %v937_v52, 0  ;;  %4097 = vmatpush3.bf16.msra.mxu0 %v4408_v23  ;;  %vm3881_vm11 = vmneg %vm5057_vm5 }
 0x11a   : > { %vm5078_vm7 = vcmp.eq.s32.totalorder %v923_v57, 0  ;;  %v5084_v38 = vpack.c.bf16 %v4908_v45, %v4885_v22  ;;  %v5089_v31 = vmax.f32 %v736_v59, 0.0  ;;  %v739_v52 = vadd.f32 %v4788_v13, %v738_v28  ;;  %2745 = vmatmul.mubr.bf16.gmra.mrb[4].mxu1 %v4957_v5  ;;  %4098 = vmatprep.subr.bf16.mxu0 %v4411_v46  ;;  %v4415_v22 = vld [vmem:[%s5708_s5 + $0x1d0] sm:$0xff]  }
 0x11b   : > { %v5094_v36 = vor.u32 %v1581_v19, %v4994_v43  ;;  %v1587_v57 = vrot.slane %v1585_v17, 1  ;;  %v1299_v45 = vsel %vm4948_vm1, 0.0, %v5066_v6  ;;  %v5102_v24 = vmax.f32 %v747_v27, 0.0  ;;  %2752 = vmatprep.mubr.bf16.mxu1 %v5005_v26  ;;  %4037 = vmatpush3.bf16.msra.mxu1 %v4404_v51  ;;  %v4413_v19 = vld [vmem:[%s5708_s5 + $0x168] sm:$0xff]  }
 0x11c   : > { %v1680_v25 = vor.u32 %v1678_v16, %v1677_v61  ;;  %v1683_v5 = vshrl.u32 %v5040_v4, 16  ;;  %vm5114_vm9 = vcmp.eq.s32.totalorder %v930_v3, 15  ;;  %v1297_v50 = vsel %vm4967_vm2, 0.0, %v5089_v31  ;;  %4038 = vmatprep.subr.bf16.mxu1 %v4405_v35 }
 0x11d   : > { %v5124_v12 = vmax.f32 %v739_v52, 0.0  ;;  %v5128_v37 = vsel %vm1560_vm10, %v5094_v36, %v1587_v57  ;;  %v1686_v48 = vshll.u32 %v5040_v4, 16  ;;  %v5135_v3 = vpack.c.bf16 %v5102_v24, %v1299_v45  ;;  %4099 = vmatpush3.bf16.msra.mxu0 %v4412_v7  ;;  %v4226_v1 = vpop.f32.mrb[16].mxu0 }
 0x11e   : > { %v1390_v33 = vsel %vm4976_vm3, 0.0, %v5102_v24  ;;  %v5142_v47 = vsel %vm1450_vm12, %v4992_v21, %v1680_v25  ;;  %v5144_v60 = vrot.slane %v1683_v5, 7  ;;  %v1589_v21 = vshrl.u32 %v4923_v58, 16  ;;  %4100 = vmatprep.subr.bf16.mxu0 %v4415_v22  ;;  %v751_v8 = vpop.f32.mrb[17].mxu0  ;;  %v4410_v58 = vld [vmem:[%s5708_s5 + $0x120] sm:$0xff]  }
 0x11f   : > { %v5150_v23 = vpack.c.bf16 %v1390_v33, %v5066_v6  ;;  %v5153_v40 = vpack.c.bf16 %v5124_v12, %v1297_v50  ;;  %v1388_v11 = vsel %vm4988_vm4, 0.0, %v5124_v12  ;;  %1426 = vst [vmem:[#allocation3 + $0x40] sm:$0xff] %v5135_v3  ;;  %v760_v4 = vadd.f32 %v4226_v1, %v4788_v13  ;;  %4039 = vmatpush3.bf16.msra.mxu1 %v4406_v10  ;;  %v4227_v51 = vpop.f32.mrb[18].mxu0  ;;  %v4422_v33 = vld [vmem:[%s5708_s5 + $0x1a0] sm:$0xff]  }
 0x120   : > { %v5164_v46 = vpack.c.bf16 %v1388_v11, %v5089_v31  ;;  %v5168_v9 = vor.u32 %v1686_v48, %v5144_v60  ;;  %v1593_v29 = vshll.u32 %v5028_v0, 16  ;;  %2842 = vmatmul.mubr.bf16.gmra.mrb[24].mxu0 %v5019_v41  ;;  %v752_v56 = vadd.f32 %v4788_v13, %v751_v8  ;;  %4040 = vmatprep.subr.bf16.mxu1 %v4409_v54  ;;  %v754_v27 = vpop.f32.mrb[19].mxu0 }
 0x121   : > { %1425 = vst [vmem:[#allocation3 + $0x38] sm:$0xff] %v5153_v40  ;;  %v1591_v59 = vor.u32 %v1589_v21, %v1587_v57  ;;  %v5179_v15 = vpack.c.bf16 %v5002_v34, %v4971_v39  ;;  %v1691_v16 = vshrl.u32 %v5025_v55, 16  ;;  %2849 = vmatprep.mubr.bf16.mxu0 %v5142_v47  ;;  %v784_v17 = vmax.f32 %v760_v4, 0.0  ;;  %4101 = vmatpush3.bf16.msra.mxu0 %v4416_v32  ;;  %v4418_v39 = vld [vmem:[%s5708_s5 + $0x198] sm:$0xff]   ;;  %v4421_v57 = vld [vmem:[%s5708_s5 + $0x1e0] sm:$0xff]  }
 0x122   : > { %v5188_v41 = vsel %vm1450_vm12, %v1677_v61, %v5168_v9  ;;  %v763_v35 = vadd.f32 %v4227_v51, %v4788_v13  ;;  %v5191_v28 = vrot.slane %v1593_v29, 1  ;;  %2753 = vmatmul.mubr.bf16.gmra.mrb[8].mxu1 %v5045_v49  ;;  %v5197_v34 = vmax.f32 %v752_v56, 0.0  ;;  %4102 = vmatprep.subr.bf16.mxu0 %v4417_v2  ;;  %v4423_v2 = vld [vmem:[%s5708_s5 + $0x1e8] sm:$0xff]  }
 0x123   : > { %v755_v7 = vadd.f32 %v4788_v13, %v754_v27  ;;  %v5200_v52 = vrot.slane %v1691_v16, 7  ;;  %v1694_v61 = vshll.u32 %v5025_v55, 16  ;;  %v1213_v22 = vsel %vm5057_vm5, 0.0, %v784_v17  ;;  %2760 = vmatprep.mubr.bf16.mxu1 %v5084_v38  ;;  %4041 = vmatpush3.bf16.msra.mxu1 %v4410_v58  ;;  %v4414_v55 = vld [vmem:[%s5708_s5 + $0x128] sm:$0xff]   ;;  %v4425_v16 = vld [vmem:[%s5708_s5 + $0x178] sm:$0xff]  }
 0x124   : > { %v785_v45 = vmax.f32 %v763_v35, 0.0  ;;  %v5211_v49 = vsel %vm1560_vm10, %v1591_v59, %v5191_v28  ;;  %v1597_v13 = vshrl.u32 %v5028_v0, 16  ;;  %v1303_v25 = vsel %vm5072_vm6, 0.0, %v1213_v22  ;;  %4042 = vmatprep.subr.bf16.mxu1 %v4413_v19  ;;  %v4419_v0 = vld [vmem:[%s5708_s5 + $0x170] sm:$0xff]  }
 0x125   : > { %v1301_v5 = vsel %vm5078_vm7, 0.0, %v5197_v34  ;;  %v5222_v10 = vmax.f32 %v755_v7, 0.0  ;;  %v1696_v50 = vor.u32 %v1694_v61, %v5200_v52  ;;  %v1601_v63 = vshll.u32 %v5011_v30, 16  ;;  %4103 = vmatpush3.bf16.msra.mxu0 %v4418_v39 }
 0x126   : > { %v1214_v48 = vsel %vm5057_vm5, 0.0, %v785_v45  ;;  %v5230_v54 = vpack.c.bf16 %v785_v45, %v784_v17  ;;  %v5233_v53 = vor.u32 %v1597_v13, %v5191_v28  ;;  %4104 = vmatprep.subr.bf16.mxu0 %v4421_v57  ;;  %v5267_v58 = vpack.c.bf16 %v4983_v42, %v4960_v14 }
 0x127   : > { %v5239_v32 = vpack.c.bf16 %v1214_v48, %v1303_v25  ;;  %v1394_v11 = vsel %vm5108_vm8, 0.0, %v1214_v48  ;;  %v5244_v1 = vpack.c.bf16 %v5222_v10, %v1301_v5  ;;  %v1392_v21 = vsel %vm5114_vm9, 0.0, %v5222_v10  ;;  %4043 = vmatpush3.bf16.msra.mxu1 %v4414_v55  ;;  %v4428_v55 = vld [vmem:[%s5708_s5 + $0x1b0] sm:$0xff]   ;;  %v5331_v48 = vld [vmem:[#allocation4 + $0x20] sm:$0xff] }
 0x128   : > { %v5252_v4 = vpack.c.bf16 %v1394_v11, %v1213_v22  ;;  %v1403_v8 = vpack.c.bf16 %v1392_v21, %v5197_v34  ;;  %v5257_v20 = vsel %vm1450_vm12, %v5144_v60, %v1696_v50  ;;  %v1603_v29 = vrot.slane %v1601_v63, 1  ;;  %2850 = vmatmul.mubr.bf16.gmra.mrb[28].mxu0 %v5128_v37  ;;  %4044 = vmatprep.subr.bf16.mxu1 %v4419_v0  ;;  %v5311_v22 = vld [vmem:[%s5708_s5 + $0x200] sm:$0xff]   ;;  %v4429_v50 = vld [vmem:[%s5708_s5 + $0x1f8] sm:$0xff]  }
 0x129   : > { %1428 = vst [vmem:[#allocation3 + $0x50] sm:$0xff] %v5239_v32  ;;  %1427 = vst [vmem:[#allocation3 + $0x48] sm:$0xff] %v5244_v1  ;;  %v1699_v56 = vshrl.u32 %v5164_v46, 16  ;;  %v1702_v51 = vshll.u32 %v5164_v46, 16  ;;  %v1605_v59 = vshrl.u32 %v5011_v30, 16  ;;  %2857 = vmatprep.mubr.bf16.mxu0 %v5188_v41  ;;  %v1609_v14 = vshll.u32 %v5153_v40, 16  ;;  %4105 = vmatpush3.bf16.msra.mxu0 %v4422_v33 }
 0x12a   : > { %v5278_v37 = vsel %vm1560_vm10, %v5233_v53, %v1603_v29  ;;  %v5283_v42 = vpack.c.bf16 %v5124_v12, %v5089_v31  ;;  %v1707_v46 = vshrl.u32 %v5150_v23, 16  ;;  %v4424_v30 = vld [vmem:[%s5708_s5 + $0x1a8] sm:$0xff]   ;;  %2761 = vmatmul.mubr.bf16.gmra.mrb[12].mxu1 %v5142_v47  ;;  %v1710_v35 = vshll.u32 %v5150_v23, 16  ;;  %4106 = vmatprep.subr.bf16.mxu0 %v4423_v2  ;;  %v4427_v31 = vld [vmem:[%s5708_s5 + $0x1f0] sm:$0xff]   ;;  %v4426_v23 = vld [vmem:[%s5708_s5 + $0x138] sm:$0xff]  }
 0x12b   : > { %v1701_v19 = vrot.slane %v1699_v56, 7  ;;  %v1607_v17 = vor.u32 %v1605_v59, %v1603_v29  ;;  %v1613_v27 = vshrl.u32 %v5153_v40, 16  ;;  %2768 = vmatprep.mubr.bf16.mxu1 %v5179_v15  ;;  %v5296_v12 = vrot.slane %v1609_v14, 1  ;;  %4045 = vmatpush3.bf16.msra.mxu1 %v4420_v18  ;;  %v1756_v0 = vld [vmem:[#allocation3 + $0x20] sm:$0xff]  ;;  %v4430_v11 = vld [vmem:[%s5708_s5 + $0x1b8] sm:$0xff]   ;;  %v1851_v59 = vld [vmem:[#allocation4 + $0x30] sm:$0xff] }
 0x12c   : > { %v1709_v39 = vrot.slane %v1707_v46, 7  ;;  %v1617_v7 = vshll.u32 %v5135_v3, 16  ;;  %v5301_v47 = vpack.c.bf16 %v5102_v24, %v5066_v6  ;;  %v1715_v61 = vshrl.u32 %v1403_v8, 16  ;;  %4046 = vmatprep.subr.bf16.mxu1 %v4425_v16 }
 0x12d   : > { %v5306_v40 = vor.u32 %v1702_v51, %v1701_v19  ;;  %v1718_v57 = vshll.u32 %v1403_v8, 16  ;;  %v5315_v45 = vsel %vm1560_vm10, %v1607_v17, %v5296_v12  ;;  %v1615_v24 = vor.u32 %v1613_v27, %v5296_v12  ;;  %4107 = vmatpush3.bf16.msra.mxu0 %v4424_v30  ;;  %v1758_v8 = vld [vmem:[#allocation3 + $0x30] sm:$0xff] }
 0x12e   : > { %v1712_v6 = vor.u32 %v1710_v35, %v1709_v39  ;;  %v1619_v13 = vrot.slane %v1617_v7, 1  ;;  %v5326_v5 = vrot.slane %v1715_v61, 7  ;;  %4108 = vmatprep.subr.bf16.mxu0 %v4427_v31  ;;  %v1779_v21 = vshll.u32 %v1756_v0, 16 }
 0x12f   : > { %v5324_v25 = vsel %vm1450_vm12, %v5200_v52, %v5306_v40  ;;  %4047 = vmatpush3.bf16.msra.mxu1 %v4426_v23  ;;  %v1869_v2 = vshrl.u32 %v5331_v48, 16  ;;  %v1783_v51 = vshrl.u32 %v1756_v0, 16  ;;  %v1795_v16 = vshll.u32 %v1758_v8, 16 }
 0x130   : > { %v5334_v63 = vsel %vm1450_vm12, %v1701_v19, %v1712_v6  ;;  %v5337_v33 = vsel %vm1560_vm10, %v1615_v24, %v1619_v13  ;;  %2858 = vmatmul.mubr.bf16.gmra.mrb[32].mxu0 %v5211_v49  ;;  %v1720_v52 = vor.u32 %v1718_v57, %v5326_v5  ;;  %4228 = vmatprep.subr.bf16.mxu1 %v5311_v22  ;;  %v1621_v49 = vshrl.u32 %v5135_v3, 16  ;;  %v1762_v19 = vld [vmem:[#allocation3 + $0x50] sm:$0x1] }
 0x131   : > { %2865 = vmatprep.mubr.bf16.mxu0 %v5257_v20  ;;  %4109 = vmatpush3.bf16.msra.mxu0 %v4428_v55  ;;  %v5353_v18 = vrot.slane %v1779_v21, 1  ;;  %v5355_v56 = vrot.slane %v1869_v2, 7  ;;  %v5365_v46 = vrot.slane %v1795_v16, 1  ;;  %v1885_v30 = vshrl.u32 %v1851_v59, 16 }
 0x132   : > { %2769 = vmatmul.mubr.bf16.gmra.mrb[16].mxu1 %v5188_v41  ;;  %v5349_v29 = vsel %vm1450_vm12, %v1709_v39, %v1720_v52  ;;  %4110 = vmatprep.subr.bf16.mxu0 %v4429_v50  ;;  %v1888_v3 = vshll.u32 %v1851_v59, 16  ;;  %v5367_v17 = vor.u32 %v1621_v49, %v1619_v13  ;;  %v1799_v27 = vshrl.u32 %v1758_v8, 16  ;;  %v1961_v50 = vld [vmem:[#allocation3 + $0x40] sm:$0xff] }
 0x133   : > { %2776 = vmatprep.mubr.bf16.mxu1 %v5267_v58  ;;  %v5358_v14 = vor.u32 %v1783_v51, %v5353_v18  ;;  %v5363_v41 = vsel %vm1450_vm12, %v5355_v56, %v5168_v9  ;;  %v1819_v31 = vshll.u32 %v5244_v1, 16  ;;  %v5379_v9 = vsel %vm1560_vm10, %v5233_v53, %v5365_v46 }
 0x134   : > { %v1887_v39 = vrot.slane %v1885_v30, 7  ;;  %v5383_v7 = vpack.c.bf16 %v5222_v10, %v5197_v34  ;;  %v1823_v23 = vshrl.u32 %v5244_v1, 16  ;;  %v1827_v57 = vshll.u32 %v1762_v19, 16  ;;  %v1964_v10 = vld [vmem:[#allocation3 + $0x58] sm:$0x1]  ;;  %v1754_v1 = vld [vmem:[#allocation3 + $0x10] sm:$0xff] }
 0x135   : > { %4111 = vmatpush3.bf16.msra.mxu0 %v4430_v11  ;;  %v5372_v35 = vsel %vm1560_vm10, %v5358_v14, %v5191_v28  ;;  %v5388_v28 = vor.u32 %v1799_v27, %v5365_v46  ;;  %v1821_v61 = vrot.slane %v1819_v31, 1  ;;  %v1920_v34 = vshll.u32 %v5252_v4, 16  ;;  %v1559_v19 = vld [vmem:[#allocation3 + $0x48] sm:$0x1] }
 0x136   : > { %v1890_v53 = vor.u32 %v1888_v3, %v1887_v39  ;;  %v5394_v6 = vsel %vm1450_vm12, %v1887_v39, %v5306_v40  ;;  %v1829_v55 = vrot.slane %v1827_v57, 1  ;;  %v2029_v52 = vshll.u32 %v1964_v10, 16 }
 0x137   : > { %v5401_v24 = vsel %vm1560_vm10, %v5388_v28, %v5296_v12  ;;  %v5405_v13 = vsel %vm1560_vm10, %v5367_v17, %v1821_v61  ;;  %v1766_v11 = vshll.u32 %v1754_v1, 16  ;;  %v2005_v12 = vshll.u32 %v1961_v50, 16 }
 0x138   : > { %2866 = vmatmul.mubr.bf16.gmra.mrb[36].mxu0 %v5278_v37  ;;  %v1917_v37 = vshrl.u32 %v5252_v4, 16  ;;  %v5409_v40 = vsel %vm1450_vm12, %v5144_v60, %v1890_v53  ;;  %v2009_v2 = vshrl.u32 %v1961_v50, 16  ;;  %v2021_v8 = vshll.u32 %v5239_v32, 16 }
 0x139   : > { %2873 = vmatprep.mubr.bf16.mxu0 %v5324_v25  ;;  %v2025_v49 = vshrl.u32 %v5239_v32, 16  ;;  %v5422_v60 = vrot.slane %v2005_v12, 1  ;;  %v2031_v16 = vrot.slane %v2029_v52, 1  ;;  %v1768_v30 = vrot.slane %v1766_v11, 1  ;;  %v4442_v12 = vld [vmem:[%s5710_s7 + $0x18] sm:$0xff]  }
 0x13a   : > { %2777 = vmatmul.mubr.bf16.gmra.mrb[20].mxu1 %v5257_v20  ;;  %v1825_v20 = vor.u32 %v1823_v23, %v1821_v61  ;;  %v1919_v4 = vrot.slane %v1917_v37, 7  ;;  %v2023_v59 = vrot.slane %v2021_v8, 1  ;;  %v1625_v23 = vshll.u32 %v1559_v19, 16 }
 0x13b   : > { %2784 = vmatprep.mubr.bf16.mxu1 %v5283_v42  ;;  %v2011_v3 = vor.u32 %v2009_v2, %v5422_v60  ;;  %v1872_v11 = vshll.u32 %v5331_v48, 16 }
 0x13c   : > { %v5412_v0 = vsel %vm1560_vm10, %v1825_v20, %v1829_v55  ;;  %v1922_v21 = vor.u32 %v1920_v34, %v1919_v4  ;;  %v5428_v32 = vsel %vm1560_vm10, %v1825_v20, %v2023_v59  ;;  %v1627_v37 = vrot.slane %v1625_v23, 1  ;;  %v4432_v20 = vld [vmem:[%s5708_s5 + $0x208] sm:$0xff]  }
 0x13d   : > { %v5431_v27 = vsel %vm1560_vm10, %v2011_v3, %v1821_v61  ;;  %v1847_v61 = vld [vmem:[#allocation4 + $0x10] sm:$0x80]  ;;  %v5536_v3 = vld [vmem:[%s5709_s6] ss:$0 sm:$0xff] }
 0x13e   : > { %v5419_v51 = vsel %vm1450_vm12, %v5326_v5, %v1922_v21  ;;  %v1764_v5 = vshrl.u32 %v1754_v1, 16  ;;  %v1628_v34 = vsel %vm1560_vm10, %v5367_v17, %v1627_v37  ;;  %v1857_v55 = vshrl.u32 %v1847_v61, 16  ;;  %v4433_v17 = vld [vmem:[%s5708_s5 + $0x210] sm:$0xff]   ;;  %v4436_v21 = vld [vmem:[%s5708_s5 + $0x228] sm:$0xff]  }
 0x140   : > { %2874 = vmatmul.mubr.bf16.gmra.mrb[40].mxu0 %v5315_v45  ;;  %v2027_v45 = vor.u32 %v2025_v49, %v2023_v59  ;;  %v1769_v39 = vor.u32 %v1768_v30, %v1764_v5  ;;  %v1859_v4 = vrot.slane %v1857_v55, 7  ;;  %v4444_v59 = vld [vmem:[%s5710_s7 + $0x28] sm:$0xff]  }
 0x141   : > { %2881 = vmatprep.mubr.bf16.mxu0 %v5334_v63 }
 0x142   : > { %2785 = vmatmul.mubr.bf16.gmra.mrb[24].mxu1 %v5324_v25  ;;  %v5434_v31 = vsel %vm1560_vm10, %v2027_v45, %v2031_v16  ;;  %v1848_v25 = vld [vmem:[#allocation4 + $0x18] sm:$0xff]  ;;  %v1774_v57 = vsel %vm1560_vm10, %v1769_v39, %v4994_v43  ;;  %v1782_v43 = vsel %vm1560_vm10, %v5094_v36, %v5353_v18  ;;  %v1874_v36 = vor.u32 %v1872_v11, %v5355_v56  ;;  %v4445_v39 = vld [vmem:[%s5710_s7 + $0x30] sm:$0xff]  }
 0x143   : > { %2792 = vmatprep.mubr.bf16.mxu1 %v5301_v47  ;;  %v1861_v53 = vshrl.u32 %v1848_v25, 16  ;;  %v1864_v1 = vshll.u32 %v1848_v25, 16  ;;  %v4438_v56 = vld [vmem:[%s5708_s5 + $0x238] sm:$0xff]  }
 0x145   : > { %v1863_v10 = vrot.slane %v1861_v53, 7 }
 0x147   : > { %v1866_v50 = vor.u32 %v1864_v1, %v1863_v10  ;;  %v1875_v48 = vsel %vm1450_vm12, %v1863_v10, %v1874_v36  ;;  %v4446_v10 = vld [vmem:[%s5710_s7 + $0x38] sm:$0xff]  }
 0x148   : > { %2882 = vmatmul.mubr.bf16.gmra.mrb[44].mxu0 %v5337_v33 }
 0x149   : > { %2889 = vmatprep.mubr.bf16.mxu0 %v5349_v29  ;;  %v1867_v52 = vsel %vm1450_vm12, %v1859_v4, %v1866_v50  ;;  %vm3883_vm12 = vmpackc.low %vm3881_vm11, %vm3881_vm11 }
 0x14a   : > { %2793 = vmatmul.mubr.bf16.gmra.mrb[28].mxu1 %v5334_v63 }
 0x14b   : > { %2930 = vmatprep.mubr.bf16.mxu1 %v1774_v57 }
 0x150   : > { %2890 = vmatmul.mubr.bf16.gmra.mrb[48].mxu0 %v1628_v34 }
 0x151   : > { %3027 = vmatprep.mubr.bf16.mxu0 %v5005_v26 }
 0x152   : > { %2931 = vmatmul.mubr.bf16.vlgmr.msra.gmra.mrb[32].mxu1 %v4868_v62  ;;  %v4434_v62 = vld [vmem:[%s5708_s5 + $0x218] sm:$0xff]  }
 0x153   : > { %4229 = vmatpush3.bf16.msra.mxu1 %v5311_v22  ;;  %2938 = vmatprep.mubr.bf16.mxu1 %v1782_v43  ;;  %v4435_v22 = vld [vmem:[%s5708_s5 + $0x220] sm:$0xff]  }
 0x154   : > { %4230 = vmatprep.subr.bf16.mxu1 %v4432_v20 }
 0x157   : > { %4231 = vmatpush3.bf16.msra.mxu1 %v4432_v20 }
 0x158   : > { %3028 = vmatmul.mubr.bf16.vlgmr.msra.gmra.mrb[52].mxu0 %v1867_v52  ;;  %4232 = vmatprep.subr.bf16.mxu1 %v4433_v17 }
 0x159   : > { %3035 = vmatprep.mubr.bf16.mxu0 %v5084_v38 }
 0x15a   : > { %2939 = vmatmul.mubr.bf16.gmra.mrb[36].mxu1 %v5005_v26  ;;  %v4437_v26 = vld [vmem:[%s5708_s5 + $0x230] sm:$0xff]  }
 0x15b   : > { %2946 = vmatprep.mubr.bf16.mxu1 %v5372_v35  ;;  %4233 = vmatpush3.bf16.msra.mxu1 %v4433_v17 }
 0x15c   : > { %4234 = vmatprep.subr.bf16.mxu1 %v4434_v62 }
 0x15f   : > { %4235 = vmatpush3.bf16.msra.mxu1 %v4434_v62 }
 0x160   : > { %3036 = vmatmul.mubr.bf16.gmra.mrb[56].mxu0 %v1875_v48  ;;  %4236 = vmatprep.subr.bf16.mxu1 %v4435_v22 }
 0x161   : > { %3043 = vmatprep.mubr.bf16.mxu0 %v5179_v15 }
 0x162   : > { %2947 = vmatmul.mubr.bf16.gmra.mrb[40].mxu1 %v5084_v38  ;;  %v1956_v38 = vld [vmem:[#allocation3 + $0x18] sm:$0xff] }
 0x163   : > { %2954 = vmatprep.mubr.bf16.mxu1 %v5379_v9  ;;  %4237 = vmatpush3.bf16.msra.mxu1 %v4435_v22 }
 0x164   : > { %4238 = vmatprep.subr.bf16.mxu1 %v4436_v21 }
 0x167   : > { %4239 = vmatpush3.bf16.msra.mxu1 %v4436_v21 }
 0x168   : > { %3044 = vmatmul.mubr.bf16.gmra.mrb[60].mxu0 %v5363_v41  ;;  %4240 = vmatprep.subr.bf16.mxu1 %v4437_v26  ;;  %v1966_v41 = vshrl.u32 %v1956_v38, 16 }
 0x169   : > { %3051 = vmatprep.mubr.bf16.mxu0 %v5267_v58 }
 0x16a   : > { %2955 = vmatmul.mubr.bf16.gmra.mrb[44].mxu1 %v5179_v15  ;;  %v1968_v15 = vshll.u32 %v1956_v38, 16 }
 0x16b   : > { %2962 = vmatprep.mubr.bf16.mxu1 %v5401_v24  ;;  %4241 = vmatpush3.bf16.msra.mxu1 %v4437_v26 }
 0x16c   : > { %4242 = vmatprep.subr.bf16.mxu1 %v4438_v56 }
 0x16f   : > { %4243 = vmatpush3.bf16.msra.mxu1 %v4438_v56 }
 0x170   : > { %3052 = vmatmul.mubr.bf16.gmra.mrb[64].mxu0 %v5409_v40 }
 0x171   : > { %3059 = vmatprep.mubr.bf16.mxu0 %v5283_v42 }
 0x172   : > { %2963 = vmatmul.mubr.bf16.gmra.mrb[48].mxu1 %v5267_v58  ;;  %v1970_v58 = vrot.slane %v1968_v15, 1 }
 0x173   : > { %2970 = vmatprep.mubr.bf16.mxu1 %v5337_v33  ;;  %v1958_v33 = vld [vmem:[#allocation3 + $0x28] sm:$0xff] }
 0x174   : > { %v1981_v35 = vshll.u32 %v1958_v33, 16 }
 0x176   : > { %v1983_v9 = vrot.slane %v1981_v35, 1 }
 0x178   : > { %3060 = vmatmul.mubr.bf16.gmra.mrb[68].mxu0 %v5394_v6  ;;  %v1960_v6 = vld [vmem:[#allocation3 + $0x38] sm:$0xff] }
 0x179   : > { %3067 = vmatprep.mubr.bf16.mxu0 %v5301_v47  ;;  %v1997_v44 = vshll.u32 %v1960_v6, 16 }
 0x17a   : > { %2971 = vmatmul.mubr.bf16.gmra.mrb[52].mxu1 %v5283_v42  ;;  %v1971_v42 = vor.u32 %v1970_v58, %v1966_v41 }
 0x17b   : > { %2978 = vmatprep.mubr.bf16.mxu1 %v5405_v13  ;;  %v1984_v13 = vsel %vm1560_vm10, %v5358_v14, %v1983_v9  ;;  %v4439_v14 = vld [vmem:[%s5710_s7] sm:$0xff]  }
 0x17c   : > { %4260 = vmatprep.subr.bf16.mxu0 %v4439_v14  ;;  %4292 = vmatprep.subr.bf16.mxu1 %v4439_v14 }
 0x17d   : > { %4261 = vmatpush3.bf16.msra.mxu0 %v4439_v14 }
 0x180   : > { %3068 = vmatmul.mubr.bf16.gmra.mrb[72].mxu0 %v5334_v63  ;;  %v1985_v63 = vshrl.u32 %v1958_v33, 16 }
 0x181   : > { %3075 = vmatprep.mubr.bf16.mxu0 %v5383_v7 }
 0x182   : > { %2979 = vmatmul.mubr.bf16.gmra.mrb[56].mxu1 %v5301_v47  ;;  %v1976_v47 = vsel %vm1560_vm10, %v1971_v42, %v5353_v18  ;;  %v1987_v24 = vor.u32 %v1985_v63, %v1983_v9 }
 0x183   : > { %2986 = vmatprep.mubr.bf16.mxu1 %v5412_v0 }
 0x188   : > { %3076 = vmatmul.mubr.bf16.gmra.mrb[76].mxu0 %v5349_v29  ;;  %v2001_v29 = vshrl.u32 %v1960_v6, 16 }
 0x189   : > { %3885 = vmatprep.mubr.msk.bf16.mxu0 %vm3883_vm12, %v5230_v54  ;;  %v1992_v54 = vsel %vm1560_vm10, %v1987_v24, %v5365_v46  ;;  %v4440_v46 = vld [vmem:[%s5710_s7 + $0x8] sm:$0xff]  }
 0x18a   : > { %2987 = vmatmul.mubr.bf16.gmra.mrb[60].mxu1 %v5383_v7  ;;  %v1999_v7 = vrot.slane %v1997_v44, 1  ;;  %4262 = vmatprep.subr.bf16.mxu0 %v4440_v46 }
 0x18b   : > { %4244 = vmatprep.mubr.bf16.mxu1 %v1976_v47  ;;  %4263 = vmatpush3.bf16.msra.mxu0 %v4440_v46 }
 0x18c   : > { %v2003_v40 = vor.u32 %v2001_v29, %v1999_v7  ;;  %v2000_v18 = vsel %vm1560_vm10, %v5388_v28, %v1999_v7  ;;  %v4441_v28 = vld [vmem:[%s5710_s7 + $0x10] sm:$0xff]  }
 0x18d   : > { %4264 = vmatprep.subr.bf16.mxu0 %v4441_v28 }
 0x18e   : > { %v2008_v0 = vsel %vm1560_vm10, %v2003_v40, %v5422_v60  ;;  %v4443_v60 = vld [vmem:[%s5710_s7 + $0x20] sm:$0xff]  }
 0x18f   : > { %4265 = vmatpush3.bf16.msra.mxu0 %v4441_v28 }
 0x190   : > { %3084 = vmatmul.mubr.bf16.gmra.mrb[80].mxu0 %v5419_v51  ;;  %4266 = vmatprep.subr.bf16.mxu0 %v4442_v12 }
 0x192   : > { %4245 = vmatmul.mubr.bf16.vlgmr.msra.gmra.mrb[64].mxu1 %v1984_v13 }
 0x193   : > { %4248 = vmatprep.mubr.bf16.mxu1 %v1992_v54  ;;  %4300 = vmatpush3.bf16.msra.mxu1 %v4439_v14 }
 0x194   : > { %4293 = vmatprep.subr.bf16.mxu1 %v4440_v46  ;;  %4267 = vmatpush3.bf16.msra.mxu0 %v4442_v12 }
 0x195   : > { %4268 = vmatprep.subr.bf16.mxu0 %v4443_v60 }
 0x197   : > { %4301 = vmatpush3.bf16.msra.mxu1 %v4440_v46 }
 0x198   : > { %4294 = vmatprep.subr.bf16.mxu1 %v4441_v28  ;;  %4269 = vmatpush3.bf16.msra.mxu0 %v4443_v60 }
 0x199   : > { %4270 = vmatprep.subr.bf16.mxu0 %v4444_v59 }
 0x19a   : > { %4249 = vmatmul.mubr.bf16.gmra.mrb[68].mxu1 %v2000_v18 }
 0x19b   : > { %4252 = vmatprep.mubr.bf16.mxu1 %v2008_v0  ;;  %4302 = vmatpush3.bf16.msra.mxu1 %v4441_v28 }
 0x19c   : > { %4295 = vmatprep.subr.bf16.mxu1 %v4442_v12  ;;  %4271 = vmatpush3.bf16.msra.mxu0 %v4444_v59 }
 0x19d   : > { %4272 = vmatprep.subr.bf16.mxu0 %v4445_v39 }
 0x19f   : > { %4303 = vmatpush3.bf16.msra.mxu1 %v4442_v12 }
 0x1a0   : > { %4296 = vmatprep.subr.bf16.mxu1 %v4443_v60  ;;  %4273 = vmatpush3.bf16.msra.mxu0 %v4445_v39 }
 0x1a1   : > { %4274 = vmatprep.subr.bf16.mxu0 %v4446_v10 }
 0x1a2   : > { %4253 = vmatmul.mubr.bf16.gmra.mrb[72].mxu1 %v5431_v27 }
 0x1a3   : > { %4256 = vmatprep.mubr.bf16.mxu1 %v5428_v32  ;;  %4304 = vmatpush3.bf16.msra.mxu1 %v4443_v60 }
 0x1a4   : > { %4297 = vmatprep.subr.bf16.mxu1 %v4444_v59  ;;  %4275 = vmatpush3.bf16.msra.mxu0 %v4446_v10 }
 0x1a7   : > { %4305 = vmatpush3.bf16.msra.mxu1 %v4444_v59 }
 0x1a8   : > { %4298 = vmatprep.subr.bf16.mxu1 %v4445_v39 }
 0x1aa   : > { %4257 = vmatmul.mubr.bf16.gmra.mrb[76].mxu1 %v5434_v31 }
 0x1ab   : > { %4306 = vmatpush3.bf16.msra.mxu1 %v4445_v39 }
 0x1ac   : > { %4299 = vmatprep.subr.bf16.mxu1 %v4446_v10 }
 0x1af   : > { %4307 = vmatpush3.bf16.msra.mxu1 %v4446_v10 }
 0x1e4   : > { %v3920_v2 = vpop.f32.mrb[0].mxu1 }
 0x1e5   : > { %v3921_v8 = vpop.f32.mrb[1].mxu1 }
 0x1e6   : > { %v3922_v49 = vadd.f32 %v3921_v8, %v3920_v2  ;;  %v3923_v51 = vpop.f32.mrb[2].mxu1 }
 0x1e7   : > { %v3924_v16 = vpop.f32.mrb[3].mxu1 }
 0x1e8   : > { %v3925_v30 = vadd.f32 %v3924_v16, %v3923_v51  ;;  %v2739_v5 = vadd.f32 %v3922_v49, %v5536_v3 }
 0x1ea   : > { %v2742_v25 = vadd.f32 %v3925_v30, %v5536_v3 }
 0x1eb   : > { %v3984_v32 = vpop.f32.mrb[20].mxu0 }
 0x1ec   : > { %v3985_v45 = vpop.f32.mrb[21].mxu0 }
 0x1ed   : > { %v3986_v19 = vadd.f32 %v3985_v45, %v3984_v32  ;;  %v3987_v27 = vpop.f32.mrb[22].mxu0  ;;  %v3926_v31 = vpop.f32.mrb[4].mxu1 }
 0x1ee   : > { %v3988_v23 = vpop.f32.mrb[23].mxu0  ;;  %v3927_v57 = vpop.f32.mrb[5].mxu1 }
 0x1ef   : > { %v3989_v37 = vadd.f32 %v3988_v23, %v3987_v27  ;;  %v3928_v53 = vadd.f32 %v3927_v57, %v3926_v31  ;;  %v3929_v61 = vpop.f32.mrb[6].mxu1  ;;  %v5543_v34 = vadd.f32 %v3986_v19, %v2739_v5 }
 0x1f0   : > { %v3930_v1 = vpop.f32.mrb[7].mxu1 }
 0x1f1   : > { %v3931_v20 = vadd.f32 %v3930_v1, %v3929_v61  ;;  %v5548_v55 = vadd.f32 %v3989_v37, %v2742_v25  ;;  %v2747_v17 = vadd.f32 %v3928_v53, %v5536_v3 }
 0x1f3   : > { %v3990_v43 = vpop.f32.mrb[24].mxu0  ;;  %v2750_v48 = vadd.f32 %v3931_v20, %v5536_v3 }
 0x1f4   : > { %v3991_v50 = vpop.f32.mrb[25].mxu0 }
 0x1f5   : > { %v3992_v4 = vadd.f32 %v3991_v50, %v3990_v43  ;;  %v3993_v52 = vpop.f32.mrb[26].mxu0  ;;  %v3932_v11 = vpop.f32.mrb[8].mxu1 }
 0x1f6   : > { %v3994_v62 = vpop.f32.mrb[27].mxu0  ;;  %v3933_v36 = vpop.f32.mrb[9].mxu1 }
 0x1f7   : > { %v5551_v22 = vadd.f32 %v3992_v4, %v2747_v17  ;;  %v3995_v21 = vadd.f32 %v3994_v62, %v3993_v52  ;;  %v3934_v26 = vadd.f32 %v3933_v36, %v3932_v11  ;;  %v3935_v56 = vpop.f32.mrb[10].mxu1 }
 0x1f8   : > { %v3936_v38 = vpop.f32.mrb[11].mxu1 }
 0x1f9   : > { %v5554_v15 = vadd.f32 %v3995_v21, %v2750_v48  ;;  %v3937_v41 = vadd.f32 %v3936_v38, %v3935_v56  ;;  %v2755_v42 = vadd.f32 %v3934_v26, %v5536_v3 }
 0x1fb   : > { %v3996_v58 = vpop.f32.mrb[28].mxu0  ;;  %v2758_v44 = vadd.f32 %v3937_v41, %v5536_v3 }
 0x1fc   : > { %v3997_v33 = vpop.f32.mrb[29].mxu0 }
 0x1fd   : > { %v3998_v35 = vadd.f32 %v3997_v33, %v3996_v58  ;;  %v3999_v47 = vpop.f32.mrb[30].mxu0  ;;  %v3938_v63 = vpop.f32.mrb[12].mxu1 }
 0x1fe   : > { %v4000_v9 = vpop.f32.mrb[31].mxu0  ;;  %v3939_v6 = vpop.f32.mrb[13].mxu1 }
 0x1ff   : > { %v5557_v24 = vadd.f32 %v3998_v35, %v2755_v42  ;;  %v4001_v13 = vadd.f32 %v4000_v9, %v3999_v47  ;;  %v3940_v54 = vadd.f32 %v3939_v6, %v3938_v63  ;;  %v3941_v29 = vpop.f32.mrb[14].mxu1 }
 0x200   : > { %v3942_v7 = vpop.f32.mrb[15].mxu1 }
 0x201   : > { %v5560_v40 = vadd.f32 %v4001_v13, %v2758_v44  ;;  %v3943_v18 = vadd.f32 %v3942_v7, %v3941_v29  ;;  %v2763_v46 = vadd.f32 %v3940_v54, %v5536_v3 }
 0x203   : > { %v4002_v0 = vpop.f32.mrb[32].mxu0  ;;  %v2766_v60 = vadd.f32 %v3943_v18, %v5536_v3 }
 0x204   : > { %v4003_v14 = vpop.f32.mrb[33].mxu0 }
 0x205   : > { %v4004_v28 = vadd.f32 %v4003_v14, %v4002_v0  ;;  %v4005_v12 = vpop.f32.mrb[34].mxu0  ;;  %v3944_v2 = vpop.f32.mrb[16].mxu1 }
 0x206   : > { %v4006_v8 = vpop.f32.mrb[35].mxu0  ;;  %v3945_v49 = vpop.f32.mrb[17].mxu1 }
 0x207   : > { %v5563_v51 = vadd.f32 %v4004_v28, %v2763_v46  ;;  %v4007_v59 = vadd.f32 %v4006_v8, %v4005_v12  ;;  %v3946_v16 = vadd.f32 %v3945_v49, %v3944_v2  ;;  %v3947_v30 = vpop.f32.mrb[18].mxu1 }
 0x208   : > { %v3948_v32 = vpop.f32.mrb[19].mxu1 }
 0x209   : > { %v5566_v45 = vadd.f32 %v4007_v59, %v2766_v60  ;;  %v3949_v19 = vadd.f32 %v3948_v32, %v3947_v30  ;;  %v2771_v31 = vadd.f32 %v3946_v16, %v5536_v3 }
 0x20b   : > { %v4008_v5 = vpop.f32.mrb[36].mxu0  ;;  %v2774_v61 = vadd.f32 %v3949_v19, %v5536_v3 }
 0x20c   : > { %v4009_v27 = vpop.f32.mrb[37].mxu0 }
 0x20d   : > { %v4010_v39 = vadd.f32 %v4009_v27, %v4008_v5  ;;  %v4011_v23 = vpop.f32.mrb[38].mxu0  ;;  %v3950_v25 = vpop.f32.mrb[20].mxu1 }
 0x20e   : > { %v4012_v57 = vpop.f32.mrb[39].mxu0  ;;  %v3951_v37 = vpop.f32.mrb[21].mxu1 }
 0x20f   : > { %v5569_v53 = vadd.f32 %v4010_v39, %v2771_v31  ;;  %v4013_v10 = vadd.f32 %v4012_v57, %v4011_v23  ;;  %v3952_v1 = vadd.f32 %v3951_v37, %v3950_v25  ;;  %v3953_v20 = vpop.f32.mrb[22].mxu1 }
 0x210   : > { %v3954_v43 = vpop.f32.mrb[23].mxu1 }
 0x211   : > { %v5572_v50 = vadd.f32 %v4013_v10, %v2774_v61  ;;  %v3955_v17 = vadd.f32 %v3954_v43, %v3953_v20  ;;  %v2779_v11 = vadd.f32 %v3952_v1, %v5536_v3 }
 0x213   : > { %v4014_v4 = vpop.f32.mrb[40].mxu0  ;;  %v2782_v38 = vadd.f32 %v3955_v17, %v5536_v3 }
 0x214   : > { %v4015_v52 = vpop.f32.mrb[41].mxu0 }
 0x215   : > { %v4016_v62 = vadd.f32 %v4015_v52, %v4014_v4  ;;  %v4017_v36 = vpop.f32.mrb[42].mxu0  ;;  %v3956_v48 = vpop.f32.mrb[24].mxu1 }
 0x216   : > { %v4018_v21 = vpop.f32.mrb[43].mxu0  ;;  %v3957_v26 = vpop.f32.mrb[25].mxu1 }
 0x217   : > { %v5575_v56 = vadd.f32 %v4016_v62, %v2779_v11  ;;  %v4019_v41 = vadd.f32 %v4018_v21, %v4017_v36  ;;  %v3958_v58 = vadd.f32 %v3957_v26, %v3956_v48  ;;  %v3959_v33 = vpop.f32.mrb[26].mxu1 }
 0x218   : > { %v3960_v42 = vpop.f32.mrb[27].mxu1 }
 0x219   : > { %v5578_v35 = vadd.f32 %v4019_v41, %v2782_v38  ;;  %v3961_v47 = vadd.f32 %v3960_v42, %v3959_v33  ;;  %v2787_v6 = vadd.f32 %v3958_v58, %v5536_v3 }
 0x21b   : > { %v4020_v63 = vpop.f32.mrb[44].mxu0  ;;  %v2790_v0 = vadd.f32 %v3961_v47, %v5536_v3 }
 0x21c   : > { %v4021_v9 = vpop.f32.mrb[45].mxu0 }
 0x21d   : > { %v4022_v44 = vadd.f32 %v4021_v9, %v4020_v63  ;;  %v4023_v13 = vpop.f32.mrb[46].mxu0  ;;  %v3962_v54 = vpop.f32.mrb[28].mxu1 }
 0x21e   : > { %v4024_v29 = vpop.f32.mrb[47].mxu0  ;;  %v3963_v7 = vpop.f32.mrb[29].mxu1 }
 0x21f   : > { %v5581_v18 = vadd.f32 %v4022_v44, %v2787_v6  ;;  %v4025_v14 = vadd.f32 %v4024_v29, %v4023_v13  ;;  %v3964_v46 = vadd.f32 %v3963_v7, %v3962_v54  ;;  %v3965_v28 = vpop.f32.mrb[30].mxu1 }
 0x220   : > { %v3966_v12 = vpop.f32.mrb[31].mxu1 }
 0x221   : > { %v5584_v2 = vadd.f32 %v4025_v14, %v2790_v0  ;;  %v3967_v8 = vadd.f32 %v3966_v12, %v3965_v28  ;;  %v2795_v59 = vadd.f32 %v3964_v46, %v5536_v3 }
 0x223   : > { %v4026_v49 = vpop.f32.mrb[48].mxu0  ;;  %v2798_v31 = vadd.f32 %v3967_v8, %v5536_v3 }
 0x224   : > { %v4027_v60 = vpop.f32.mrb[49].mxu0 }
 0x225   : > { %v4028_v16 = vadd.f32 %v4027_v60, %v4026_v49  ;;  %v4029_v30 = vpop.f32.mrb[50].mxu0  ;;  %v4048_v32 = vpop.f32.mrb[32].mxu1 }
 0x226   : > { %v4030_v19 = vpop.f32.mrb[51].mxu0  ;;  %v4049_v5 = vpop.f32.mrb[33].mxu1 }
 0x227   : > { %v5587_v27 = vadd.f32 %v4028_v16, %v2795_v59  ;;  %v4031_v39 = vadd.f32 %v4030_v19, %v4029_v30  ;;  %v4050_v23 = vadd.f32 %v4049_v5, %v4048_v32  ;;  %v4051_v25 = vpop.f32.mrb[34].mxu1 }
 0x228   : > { %v4052_v57 = vpop.f32.mrb[35].mxu1 }
 0x229   : > { %v5590_v37 = vadd.f32 %v4031_v39, %v2798_v31  ;;  %v2933_v61 = vadd.f32 %v4050_v23, %v5543_v34  ;;  %v4053_v10 = vadd.f32 %v4052_v57, %v4051_v25 }
 0x22b   : > { %v4112_v1 = vpop.f32.mrb[52].mxu0  ;;  %v2936_v20 = vadd.f32 %v4053_v10, %v5548_v55 }
 0x22c   : > { %v4113_v43 = vpop.f32.mrb[53].mxu0 }
 0x22d   : > { %v4114_v17 = vadd.f32 %v4113_v43, %v4112_v1  ;;  %v4115_v4 = vpop.f32.mrb[54].mxu0  ;;  %v4054_v52 = vpop.f32.mrb[36].mxu1 }
 0x22e   : > { %v4116_v11 = vpop.f32.mrb[55].mxu0  ;;  %v4055_v62 = vpop.f32.mrb[37].mxu1 }
 0x22f   : > { %v4117_v36 = vadd.f32 %v4116_v11, %v4115_v4  ;;  %v4056_v3 = vadd.f32 %v4055_v62, %v4054_v52  ;;  %v4057_v48 = vpop.f32.mrb[38].mxu1  ;;  %v5594_v21 = vadd.f32 %v4114_v17, %v2933_v61 }
 0x230   : > { %v4058_v26 = vpop.f32.mrb[39].mxu1 }
 0x231   : > { %v2941_v38 = vadd.f32 %v4056_v3, %v5551_v22  ;;  %v4059_v41 = vadd.f32 %v4058_v26, %v4057_v48  ;;  %v5597_v34 = vadd.f32 %v4117_v36, %v2936_v20 }
 0x233   : > { %v4118_v58 = vpop.f32.mrb[56].mxu0  ;;  %v2944_v55 = vadd.f32 %v4059_v41, %v5554_v15 }
 0x234   : > { %v4119_v33 = vpop.f32.mrb[57].mxu0 }
 0x235   : > { %v4120_v42 = vadd.f32 %v4119_v33, %v4118_v58  ;;  %v4121_v47 = vpop.f32.mrb[58].mxu0  ;;  %v4060_v63 = vpop.f32.mrb[40].mxu1 }
 0x236   : > { %v4122_v9 = vpop.f32.mrb[59].mxu0  ;;  %v4061_v6 = vpop.f32.mrb[41].mxu1 }
 0x237   : > { %v4123_v44 = vadd.f32 %v4122_v9, %v4121_v47  ;;  %v4062_v13 = vadd.f32 %v4061_v6, %v4060_v63  ;;  %v4063_v54 = vpop.f32.mrb[42].mxu1  ;;  %v5600_v29 = vadd.f32 %v4120_v42, %v2941_v38 }
 0x238   : > { %v4064_v7 = vpop.f32.mrb[43].mxu1 }
 0x239   : > { %v2949_v22 = vadd.f32 %v4062_v13, %v5557_v24  ;;  %v4065_v0 = vadd.f32 %v4064_v7, %v4063_v54  ;;  %v5603_v14 = vadd.f32 %v4123_v44, %v2944_v55 }
 0x23b   : > { %v4124_v46 = vpop.f32.mrb[60].mxu0  ;;  %v2952_v15 = vadd.f32 %v4065_v0, %v5560_v40 }
 0x23c   : > { %v4125_v28 = vpop.f32.mrb[61].mxu0 }
 0x23d   : > { %v4126_v12 = vadd.f32 %v4125_v28, %v4124_v46  ;;  %v4127_v8 = vpop.f32.mrb[62].mxu0  ;;  %v4066_v49 = vpop.f32.mrb[44].mxu1 }
 0x23e   : > { %v4128_v60 = vpop.f32.mrb[63].mxu0  ;;  %v4067_v59 = vpop.f32.mrb[45].mxu1 }
 0x23f   : > { %v4129_v16 = vadd.f32 %v4128_v60, %v4127_v8  ;;  %v4068_v30 = vadd.f32 %v4067_v59, %v4066_v49  ;;  %v4069_v32 = vpop.f32.mrb[46].mxu1  ;;  %v5606_v19 = vadd.f32 %v4126_v12, %v2949_v22 }
 0x240   : > { %v4070_v5 = vpop.f32.mrb[47].mxu1 }
 0x241   : > { %v2957_v24 = vadd.f32 %v4068_v30, %v5563_v51  ;;  %v4071_v31 = vadd.f32 %v4070_v5, %v4069_v32  ;;  %v5609_v39 = vadd.f32 %v4129_v16, %v2952_v15 }
 0x243   : > { %v4130_v23 = vpop.f32.mrb[64].mxu0  ;;  %v2960_v40 = vadd.f32 %v4071_v31, %v5566_v45 }
 0x244   : > { %v4131_v25 = vpop.f32.mrb[65].mxu0 }
 0x245   : > { %v4132_v57 = vadd.f32 %v4131_v25, %v4130_v23  ;;  %v4133_v61 = vpop.f32.mrb[66].mxu0  ;;  %v4072_v10 = vpop.f32.mrb[48].mxu1 }
 0x246   : > { %v4134_v1 = vpop.f32.mrb[67].mxu0  ;;  %v4073_v20 = vpop.f32.mrb[49].mxu1 }
 0x247   : > { %v4135_v43 = vadd.f32 %v4134_v1, %v4133_v61  ;;  %v4074_v17 = vadd.f32 %v4073_v20, %v4072_v10  ;;  %v4075_v4 = vpop.f32.mrb[50].mxu1  ;;  %v5612_v52 = vadd.f32 %v4132_v57, %v2957_v24 }
 0x248   : > { %v4076_v11 = vpop.f32.mrb[51].mxu1 }
 0x249   : > { %v2965_v51 = vadd.f32 %v4074_v17, %v5569_v53  ;;  %v4077_v62 = vadd.f32 %v4076_v11, %v4075_v4  ;;  %v5615_v36 = vadd.f32 %v4135_v43, %v2960_v40 }
 0x24b   : > { %v4136_v3 = vpop.f32.mrb[68].mxu0  ;;  %v2968_v45 = vadd.f32 %v4077_v62, %v5572_v50 }
 0x24c   : > { %v4137_v48 = vpop.f32.mrb[69].mxu0 }
 0x24d   : > { %v4138_v26 = vadd.f32 %v4137_v48, %v4136_v3  ;;  %v4139_v38 = vpop.f32.mrb[70].mxu0  ;;  %v4078_v41 = vpop.f32.mrb[52].mxu1 }
 0x24e   : > { %v4140_v58 = vpop.f32.mrb[71].mxu0  ;;  %v4079_v55 = vpop.f32.mrb[53].mxu1 }
 0x24f   : > { %v4141_v33 = vadd.f32 %v4140_v58, %v4139_v38  ;;  %v4080_v42 = vadd.f32 %v4079_v55, %v4078_v41  ;;  %v4081_v47 = vpop.f32.mrb[54].mxu1  ;;  %v5618_v63 = vadd.f32 %v4138_v26, %v2965_v51 }
 0x250   : > { %v4082_v9 = vpop.f32.mrb[55].mxu1 }
 0x251   : > { %v2973_v53 = vadd.f32 %v4080_v42, %v5575_v56  ;;  %v4083_v6 = vadd.f32 %v4082_v9, %v4081_v47  ;;  %v5621_v44 = vadd.f32 %v4141_v33, %v2968_v45 }
 0x253   : > { %v4142_v13 = vpop.f32.mrb[72].mxu0  ;;  %v2976_v50 = vadd.f32 %v4083_v6, %v5578_v35 }
 0x254   : > { %v4143_v54 = vpop.f32.mrb[73].mxu0 }
 0x255   : > { %v4144_v7 = vadd.f32 %v4143_v54, %v4142_v13  ;;  %v4145_v22 = vpop.f32.mrb[74].mxu0  ;;  %v4084_v0 = vpop.f32.mrb[56].mxu1 }
 0x256   : > { %v4146_v46 = vpop.f32.mrb[75].mxu0  ;;  %v4085_v15 = vpop.f32.mrb[57].mxu1 }
 0x257   : > { %v4147_v28 = vadd.f32 %v4146_v46, %v4145_v22  ;;  %v4086_v12 = vadd.f32 %v4085_v15, %v4084_v0  ;;  %v4087_v8 = vpop.f32.mrb[58].mxu1  ;;  %v3070_v49 = vadd.f32 %v4144_v7, %v2973_v53 }
 0x258   : > { %v4088_v60 = vpop.f32.mrb[59].mxu1 }
 0x259   : > { %v2981_v59 = vadd.f32 %v4086_v12, %v5581_v18  ;;  %v4089_v56 = vadd.f32 %v4088_v60, %v4087_v8  ;;  %v3073_v16 = vadd.f32 %v4147_v28, %v2976_v50 }
 0x25b   : > { %v4148_v30 = vpop.f32.mrb[76].mxu0  ;;  %v2984_v32 = vadd.f32 %v4089_v56, %v5584_v2 }
 0x25c   : > { %v4149_v5 = vpop.f32.mrb[77].mxu0 }
 0x25d   : > { %v4150_v35 = vadd.f32 %v4149_v5, %v4148_v30  ;;  %v4151_v24 = vpop.f32.mrb[78].mxu0  ;;  %v4090_v31 = vpop.f32.mrb[60].mxu1 }
 0x25e   : > { %v4152_v23 = vpop.f32.mrb[79].mxu0  ;;  %v4091_v40 = vpop.f32.mrb[61].mxu1 }
 0x25f   : > { %v4153_v25 = vadd.f32 %v4152_v23, %v4151_v24  ;;  %v4092_v57 = vadd.f32 %v4091_v40, %v4090_v31  ;;  %v4093_v61 = vpop.f32.mrb[62].mxu1  ;;  %v5626_v10 = vadd.f32 %v4150_v35, %v2981_v59 }
 0x260   : > { %v4094_v1 = vpop.f32.mrb[63].mxu1 }
 0x261   : > { %v2989_v20 = vadd.f32 %v4092_v57, %v5587_v27  ;;  %v4095_v18 = vadd.f32 %v4094_v1, %v4093_v61  ;;  %v5629_v43 = vadd.f32 %v4153_v25, %v2984_v32 }
 0x263   : > { %v4154_v17 = vpop.f32.mrb[80].mxu0  ;;  %v2992_v2 = vadd.f32 %v4095_v18, %v5590_v37 }
 0x264   : > { %v4155_v4 = vpop.f32.mrb[81].mxu0 }
 0x265   : > { %v4156_v11 = vadd.f32 %v4155_v4, %v4154_v17  ;;  %v4157_v51 = vpop.f32.mrb[82].mxu0  ;;  %v4246_v62 = vpop.f32.mrb[64].mxu1 }
 0x266   : > { %v4158_v3 = vpop.f32.mrb[83].mxu0  ;;  %v3135_v45 = vadd.f32 %v4246_v62, %v5600_v29  ;;  %v3126_v48 = vpop.f32.mrb[65].mxu1 }
 0x267   : > { %v4159_v26 = vadd.f32 %v4158_v3, %v4157_v51  ;;  %v3127_v38 = vadd.f32 %v3126_v48, %v5594_v21  ;;  %v4247_v41 = vpop.f32.mrb[66].mxu1  ;;  %v3086_v58 = vadd.f32 %v4156_v11, %v2989_v20  ;;  %v4455_v11 = vld [vmem:[%s4649_s24 + $0x8] sm:$0xff]   ;;  %v4456_v3 = vld [vmem:[%s4649_s24] sm:$0xff]  }
 0x268   : > { %v3138_v27 = vadd.f32 %v4247_v41, %v5603_v14  ;;  %v3129_v55 = vpop.f32.mrb[67].mxu1  ;;  %v3191_v37 = vmax.f32 %v3135_v45, 0.0  ;;  %v3383_v51 = vunpack.c.l.bf16 %v4455_v11  ;;  %v3381_v45 = vunpack.c.l.bf16 %v4456_v3 }
 0x269   : > { %v3130_v33 = vadd.f32 %v3129_v55, %v5597_v34  ;;  %v3089_v42 = vadd.f32 %v4159_v26, %v2992_v2  ;;  %v3189_v9 = vmax.f32 %v3127_v38, 0.0  ;;  %v3384_v26 = vunpack.c.h.bf16 %v4455_v11 }
 0x26a   : > { %v3192_v47 = vmax.f32 %v3138_v27, 0.0 }
 0x26b   : > { %v3190_v53 = vmax.f32 %v3130_v33, 0.0 }
 0x26c   : > { %v3206_v6 = vpack.c.bf16 %v3192_v47, %v3191_v37 }
 0x26d   : > { %v3205_v13 = vpack.c.bf16 %v3190_v53, %v3189_v9  ;;  %v4250_v50 = vpop.f32.mrb[68].mxu1 }
 0x26e   : > { %v3151_v29 = vadd.f32 %v4250_v50, %v5612_v52  ;;  %v3142_v54 = vpop.f32.mrb[69].mxu1 }
 0x26f   : > { %v3143_v21 = vadd.f32 %v3142_v54, %v5606_v19  ;;  %v4251_v7 = vpop.f32.mrb[70].mxu1  ;;  %4276 = vmatprep.mubr.bf16.mxu0 %v3205_v13  ;;  %v4457_v13 = vld [vmem:[%s4649_s24 + $0x18] sm:$0xff]  }
 0x270   : > { %v3154_v14 = vadd.f32 %v4251_v7, %v5615_v36  ;;  %v3145_v22 = vpop.f32.mrb[71].mxu1  ;;  %4277 = vmatmul.mubr.bf16.vlgmr.msra.gmra.mrb[84].mxu0 %v3206_v6  ;;  %v3195_v0 = vmax.f32 %v3151_v29, 0.0  ;;  %v3387_v50 = vunpack.c.l.bf16 %v4457_v13  ;;  %v4458_v7 = vld [vmem:[%s4649_s24 + $0x10] sm:$0xff]  }
 0x271   : > { %v3146_v34 = vadd.f32 %v3145_v22, %v5609_v39  ;;  %v3193_v15 = vmax.f32 %v3143_v21, 0.0 }
 0x272   : > { %v3196_v46 = vmax.f32 %v3154_v14, 0.0  ;;  %v3385_v14 = vunpack.c.l.bf16 %v4458_v7 }
 0x273   : > { %v3194_v28 = vmax.f32 %v3146_v34, 0.0 }
 0x274   : > { %v3208_v12 = vpack.c.bf16 %v3196_v46, %v3195_v0  ;;  %v3388_v46 = vunpack.c.h.bf16 %v4457_v13 }
 0x275   : > { %v3207_v8 = vpack.c.bf16 %v3194_v28, %v3193_v15  ;;  %v4254_v60 = vpop.f32.mrb[72].mxu1 }
 0x276   : > { %v3167_v59 = vadd.f32 %v4254_v60, %v3070_v49  ;;  %v3158_v52 = vpop.f32.mrb[73].mxu1 }
 0x277   : > { %v3159_v56 = vadd.f32 %v3158_v52, %v5618_v63  ;;  %v4255_v19 = vpop.f32.mrb[74].mxu1  ;;  %4280 = vmatprep.mubr.bf16.mxu1 %v3207_v8  ;;  %v3386_v8 = vunpack.c.h.bf16 %v4458_v7 }
 0x278   : > { %v3170_v30 = vadd.f32 %v4255_v19, %v3073_v16  ;;  %v3161_v32 = vpop.f32.mrb[75].mxu1  ;;  %4281 = vmatmul.mubr.bf16.vlgmr.msra.gmra.mrb[80].mxu1 %v3208_v12  ;;  %v3199_v5 = vmax.f32 %v3167_v59, 0.0 }
 0x279   : > { %v3162_v36 = vadd.f32 %v3161_v32, %v5621_v44  ;;  %v3197_v35 = vmax.f32 %v3159_v56, 0.0 }
 0x27a   : > { %v3200_v39 = vmax.f32 %v3170_v30, 0.0 }
 0x27b   : > { %v3198_v24 = vmax.f32 %v3162_v36, 0.0 }
 0x27c   : > { %v3210_v31 = vpack.c.bf16 %v3200_v39, %v3199_v5  ;;  %v4459_v39 = vld [vmem:[%s4649_s24 + $0x28] sm:$0xff]  }
 0x27d   : > { %v3209_v23 = vpack.c.bf16 %v3198_v24, %v3197_v35  ;;  %v4258_v40 = vpop.f32.mrb[76].mxu1  ;;  %v3391_v35 = vunpack.c.l.bf16 %v4459_v39 }
 0x27e   : > { %v3183_v25 = vadd.f32 %v4258_v40, %v3086_v58  ;;  %v3174_v57 = vpop.f32.mrb[77].mxu1  ;;  %v3382_v58 = vunpack.c.h.bf16 %v4456_v3  ;;  %v4460_v40 = vld [vmem:[%s4649_s24 + $0x20] sm:$0xff]  }
 0x27f   : > { %v3175_v49 = vadd.f32 %v3174_v57, %v5626_v10  ;;  %v4259_v63 = vpop.f32.mrb[78].mxu1  ;;  %4284 = vmatprep.mubr.bf16.mxu1 %v3209_v23  ;;  %v5647_v10 = vld [vmem:[%s5711_s8] ss:$0 sm:$0xff] }
 0x280   : > { %v3186_v61 = vadd.f32 %v4259_v63, %v3089_v42  ;;  %v3177_v16 = vpop.f32.mrb[79].mxu1  ;;  %4285 = vmatmul.mubr.bf16.gmra.mrb[84].mxu1 %v3210_v31  ;;  %v3203_v1 = vmax.f32 %v3183_v25, 0.0  ;;  %v3389_v25 = vunpack.c.l.bf16 %v4460_v40 }
 0x281   : > { %v3178_v44 = vadd.f32 %v3177_v16, %v5629_v43  ;;  %v3201_v18 = vmax.f32 %v3175_v49, 0.0 }
 0x282   : > { %v3204_v20 = vmax.f32 %v3186_v61, 0.0  ;;  %v3392_v61 = vunpack.c.h.bf16 %v4459_v39 }
 0x283   : > { %v3202_v17 = vmax.f32 %v3178_v44, 0.0 }
 0x284   : > { %v3212_v2 = vpack.c.bf16 %v3204_v20, %v3203_v1  ;;  %v3390_v20 = vunpack.c.h.bf16 %v4460_v40 }
 0x285   : > { %v3211_v4 = vpack.c.bf16 %v3202_v17, %v3201_v18 }
 0x287   : > { %4288 = vmatprep.mubr.bf16.mxu1 %v3211_v4 }
 0x288   : > { %4289 = vmatmul.mubr.bf16.gmra.mrb[88].mxu1 %v3212_v2 }
 0x343   : > { %v4278_v62 = vpop.f32.mrb[84].mxu0 }
 0x344   : > { %v3327_v43 = vadd.f32 %v4278_v62, %v5647_v10  ;;  %v3318_v48 = vpop.f32.mrb[85].mxu0 }
 0x345   : > { %v3319_v38 = vadd.f32 %v5647_v10, %v3318_v48  ;;  %v4279_v41 = vpop.f32.mrb[86].mxu0 }
 0x346   : > { %v3399_v27 = vadd.f32 %v3383_v51, %v3327_v43  ;;  %v3330_v55 = vadd.f32 %v4279_v41, %v5647_v10  ;;  %v3321_v33 = vpop.f32.mrb[87].mxu0  ;;  %v4461_v43 = vld [vmem:[%s4649_s24 + $0x38] sm:$0xff]  }
 0x347   : > { %v3397_v42 = vadd.f32 %v3381_v45, %v3319_v38  ;;  %v3322_v37 = vadd.f32 %v5647_v10, %v3321_v33  ;;  %v3395_v48 = vunpack.c.l.bf16 %v4461_v43 }
 0x348   : > { %v3400_v47 = vadd.f32 %v3384_v26, %v3330_v55  ;;  %v3415_v53 = vmax.f32 %v3399_v27, 0.0 }
 0x349   : > { %v3398_v9 = vadd.f32 %v3382_v58, %v3322_v37  ;;  %v3413_v29 = vmax.f32 %v3397_v42, 0.0  ;;  %v4462_v58 = vld [vmem:[%s4649_s24 + $0x30] sm:$0xff]   ;;  %v3396_v37 = vunpack.c.h.bf16 %v4461_v43 }
 0x34a   : > { %v3416_v6 = vmax.f32 %v3400_v47, 0.0  ;;  %v3393_v27 = vunpack.c.l.bf16 %v4462_v58 }
 0x34b   : > { %v3414_v54 = vmax.f32 %v3398_v9, 0.0  ;;  %v4282_v21 = vpop.f32.mrb[80].mxu1 }
 0x34c   : > { %v3837_v22 = vpack.c.bf16 %v3416_v6, %v3415_v53  ;;  %v3343_v34 = vadd.f32 %v4282_v21, %v5647_v10  ;;  %v3334_v0 = vpop.f32.mrb[81].mxu1  ;;  %v3394_v6 = vunpack.c.h.bf16 %v4462_v58 }
 0x34d   : > { %v3832_v15 = vpack.c.bf16 %v3414_v54, %v3413_v29  ;;  %v3335_v28 = vadd.f32 %v5647_v10, %v3334_v0  ;;  %v4283_v12 = vpop.f32.mrb[82].mxu1 }
 0x34e   : > { %3869 = vst [vmem:[%s5661_s20 + $0x8] sm:$0xff] %v3837_v22   ;;  %v3403_v60 = vadd.f32 %v3387_v50, %v3343_v34  ;;  %v3346_v59 = vadd.f32 %v4283_v12, %v5647_v10  ;;  %v3337_v52 = vpop.f32.mrb[83].mxu1 }
 0x34f   : > { %3833 = vst [vmem:[%s5661_s20] sm:$0xff] %v3832_v15   ;;  %v3401_v56 = vadd.f32 %v3385_v14, %v3335_v28  ;;  %v3338_v19 = vadd.f32 %v5647_v10, %v3337_v52 }
 0x350   : > { %v3404_v30 = vadd.f32 %v3388_v46, %v3346_v59  ;;  %v3419_v36 = vmax.f32 %v3403_v60, 0.0 }
 0x351   : > { %v3402_v32 = vadd.f32 %v3386_v8, %v3338_v19  ;;  %v3417_v24 = vmax.f32 %v3401_v56, 0.0 }
 0x352   : > { %v3420_v5 = vmax.f32 %v3404_v30, 0.0 }
 0x353   : > { %v3418_v31 = vmax.f32 %v3402_v32, 0.0  ;;  %v4286_v23 = vpop.f32.mrb[84].mxu1 }
 0x354   : > { %v3847_v57 = vpack.c.bf16 %v3420_v5, %v3419_v36  ;;  %v3359_v49 = vadd.f32 %v4286_v23, %v5647_v10  ;;  %v3350_v63 = vpop.f32.mrb[85].mxu1 }
 0x355   : > { %v3842_v16 = vpack.c.bf16 %v3418_v31, %v3417_v24  ;;  %v3351_v44 = vadd.f32 %v5647_v10, %v3350_v63  ;;  %v4287_v1 = vpop.f32.mrb[86].mxu1 }
 0x356   : > { %3871 = vst [vmem:[%s5661_s20 + $0x18] sm:$0xff] %v3847_v57   ;;  %v3407_v18 = vadd.f32 %v3391_v35, %v3359_v49  ;;  %v3362_v17 = vadd.f32 %v4287_v1, %v5647_v10  ;;  %v3353_v2 = vpop.f32.mrb[87].mxu1 }
 0x357   : > { %3870 = vst [vmem:[%s5661_s20 + $0x10] sm:$0xff] %v3842_v16   ;;  %v3405_v4 = vadd.f32 %v3389_v25, %v3351_v44  ;;  %v3354_v11 = vadd.f32 %v5647_v10, %v3353_v2 }
 0x358   : > { %v3408_v51 = vadd.f32 %v3392_v61, %v3362_v17  ;;  %v3423_v3 = vmax.f32 %v3407_v18, 0.0 }
 0x359   : > { %v3406_v62 = vadd.f32 %v3390_v20, %v3354_v11  ;;  %v3421_v26 = vmax.f32 %v3405_v4, 0.0 }
 0x35a   : > { %v3424_v45 = vmax.f32 %v3408_v51, 0.0 }
 0x35b   : > { %v3422_v38 = vmax.f32 %v3406_v62, 0.0  ;;  %v4290_v41 = vpop.f32.mrb[88].mxu1 }
 0x35c   : > { %v3857_v55 = vpack.c.bf16 %v3424_v45, %v3423_v3  ;;  %v3375_v33 = vadd.f32 %v4290_v41, %v5647_v10  ;;  %v3366_v42 = vpop.f32.mrb[89].mxu1 }
 0x35d   : > { %v3852_v47 = vpack.c.bf16 %v3422_v38, %v3421_v26  ;;  %v3367_v9 = vadd.f32 %v5647_v10, %v3366_v42  ;;  %v4291_v53 = vpop.f32.mrb[90].mxu1 }
 0x35e   : > { %3873 = vst [vmem:[%s5661_s20 + $0x28] sm:$0xff] %v3857_v55   ;;  %v3411_v13 = vadd.f32 %v3395_v48, %v3375_v33  ;;  %v3378_v50 = vadd.f32 %v4291_v53, %v5647_v10  ;;  %v3369_v29 = vpop.f32.mrb[91].mxu1 }
 0x35f   : > { %3872 = vst [vmem:[%s5661_s20 + $0x20] sm:$0xff] %v3852_v47   ;;  %v3409_v54 = vadd.f32 %v3393_v27, %v3367_v9  ;;  %v3370_v21 = vadd.f32 %v5647_v10, %v3369_v29 }
 0x360   : > { %v3412_v7 = vadd.f32 %v3396_v37, %v3378_v50  ;;  %v3427_v22 = vmax.f32 %v3411_v13, 0.0 }
 0x361   : > { %v3410_v14 = vadd.f32 %v3394_v6, %v3370_v21  ;;  %v3425_v0 = vmax.f32 %v3409_v54, 0.0 }
 0x362   : > { %v3428_v34 = vmax.f32 %v3412_v7, 0.0 }
 0x363   : > { %v3426_v46 = vmax.f32 %v3410_v14, 0.0 }
 0x364   : > { %v3867_v15 = vpack.c.bf16 %v3428_v34, %v3427_v22 }
 0x365   : > { %v3862_v28 = vpack.c.bf16 %v3426_v46, %v3425_v0 }
 0x366   : > { %3875 = vst [vmem:[%s5661_s20 + $0x38] sm:$0xff] %v3867_v15  }
 0x367   : > { %3874 = vst [vmem:[%s5661_s20 + $0x30] sm:$0xff] %v3862_v28  }
 0x368 PF: > { %s19_s13 = sadd.s32 1, %s4501_s13   ;;  %s5760_s30 = smov %s4493_s11 }
 0x369   : > { %p16_p12 = scmp.ge.s32.totalorder %s19_s13, 6   ;;  %s5761_s10 = smov %s4497_s12 }
 0x36a   : > { %s5762_s11 = smov %s5765_s14  ;;  %s5763_s12 = smov %s5769_s15 }
 0x36b   :  { %18 = sbr.rel (!%p16_p12) target bundleno = 3 (0x3), region = 92 }

</bundles_post_ra>
